<compile_context>
chip_gen: v7x
topology: tpu7x:2x2x1
jax: 0.10.0
libtpu: 0.0.40
codegen_flags: <defaults>
</compile_context>

<pallas_src>
import functools

import jax
import jax.numpy as jnp
from jax import lax
from jax.experimental import pallas as pl
from jax.experimental.pallas import tpu as pltpu

BN_EPS = 1e-5
_LANE = 128


# ----------------------------------------------------------------------------- #
# per-generation defaults and tile pickers
# ----------------------------------------------------------------------------- #
def _tpu_defaults():
    """(vmem_limit_bytes, preferred C_out tile widths) per TPU generation."""
    kind = ""
    try:
        dev = jax.devices()[0]
        if dev.platform == "tpu":
            kind = dev.device_kind.lower()
    except Exception:
        pass
    if "v7" in kind:                       # 64 MiB physical VMEM per TensorCore
        return 40 * 1024 * 1024, (256, 128)
    if "v5" in kind:                       # 128x128 MXU: 256-wide tiles buy nothing
        return 48 * 1024 * 1024, (128,)
    return 48 * 1024 * 1024, (256, 128)    # v6e / unknown


def _round_up(x, m):
    return (x + m - 1) // m * m


def _largest_divisor_leq(n, cap):
    cap = int(max(1, min(cap, n)))
    for d in range(cap, 0, -1):
        if n % d == 0:
            return d
    return 1


def _pick_cout_tile(cp, prefs):
    for t in prefs:
        if cp % t == 0:
            return t
    return _LANE                           # cp is always a multiple of 128


def _pick_row_tile(h, w, c_in, tc, in_bytes, y_bytes, budget):
    # resident padded image + weight block (both double-buffered by the pipeline)
    fixed = 2 * (h + 2) * (w + 2) * c_in * in_bytes + 2 * 9 * c_in * tc * in_bytes
    # per output row: y block (x2 buffers) + f32 accumulator + im2col patches (~x2)
    per_row = w * tc * (2 * y_bytes + 4) + 2 * w * 9 * c_in * in_bytes
    cap = (budget - fixed) // per_row if budget > fixed else 1
    return _largest_divisor_leq(h, cap)


# ----------------------------------------------------------------------------- #
# in-kernel 3x3 conv of one TH-row strip: single deep MXU contraction (K = 9*C_in)
# ----------------------------------------------------------------------------- #
def _conv3x3_tile(x_ref, w_ref, th):
    """x_ref: (1, H+2, W+2, C_in) spatially padded NHWC image (MXU dtype).
    w_ref: (9*C_in, TC) weights, rows ordered (kh, kw, c_in).
    Returns the f32 conv output of rows [r*TH, (r+1)*TH) flattened to (TH*W, TC)."""
    _, hp2, wp2, c_in = x_ref.shape
    h, w = hp2 - 2, wp2 - 2
    if th == h:                                       # single row tile: static view
        xt = x_ref[0]
    else:                                             # halo'd strip of the resident image
        start = pl.multiple_of(pl.program_id(2) * th, th)
        xt = x_ref[0, pl.ds(start, th + 2), :, :]
    taps = []
    for kh in range(3):
        for kw in range(3):
            taps.append(xt[kh:kh + th, kw:kw + w, :].reshape(th * w, c_in))
    patches = jnp.concatenate(taps, axis=-1)          # (TH*W, 9*C_in) im2col strip
    return jnp.dot(patches, w_ref[...], preferred_element_type=jnp.float32)


# ----------------------------------------------------------------------------- #
# kernels
# ----------------------------------------------------------------------------- #
def _conv_bn_stats_kernel(x_ref, w_ref, y_ref, sum_ref, ssq_ref):
    """Pass 1: conv strip + per-channel partial sum / sum-of-squares for this tile."""
    th = y_ref.shape[0]
    acc = _conv3x3_tile(x_ref, w_ref, th)             # (TH*W, TC) f32
    y_ref[...] = acc.reshape(y_ref.shape).astype(y_ref.dtype)
    sum_ref[...] = jnp.sum(acc, axis=0, keepdims=True)[None]
    ssq_ref[...] = jnp.sum(acc * acc, axis=0, keepdims=True)[None]


def _conv_relu_kernel(x_ref, w_ref, o_ref):
    """Fused ConvRelu block."""
    th = o_ref.shape[0]
    acc = _conv3x3_tile(x_ref, w_ref, th)
    o_ref[...] = jnp.maximum(acc, 0.0).reshape(o_ref.shape).astype(o_ref.dtype)


def _scale_shift_kernel(y_ref, scale_ref, shift_ref, o_ref, *, relu):
    """Pass 2: out = y * scale + shift (scale/shift pre-folded), optional fused ReLU."""
    out = y_ref[...].astype(jnp.float32) * scale_ref[...] + shift_ref[...]
    if relu:
        out = jnp.maximum(out, 0.0)
    o_ref[...] = out.astype(o_ref.dtype)


# ----------------------------------------------------------------------------- #
# wrappers
# ----------------------------------------------------------------------------- #
def _prep_inputs(x, weight, compute_dtype, channels_last):
    if channels_last:
        n, h, w, c_in = x.shape
        x_nhwc = x
    else:
        n, c_in, h, w = x.shape
        x_nhwc = jnp.transpose(x, (0, 2, 3, 1))
    c_out = weight.shape[0]
    assert weight.shape == (c_out, c_in, 3, 3)
    # cast once in the wrapper (halves the HBM DMA in bf16) and pad H/W for the halo
    x_pad = jnp.pad(x_nhwc.astype(compute_dtype),
                    ((0, 0), (1, 1), (1, 1), (0, 0)))
    # (C_out, C_in, 3, 3) -> (9*C_in, Cp) with rows ordered (kh, kw, c_in);
    # C_out zero-padded to a multiple of 128 lanes (unmasked stores).
    cp = _round_up(c_out, _LANE)
    w_flat = jnp.transpose(weight, (2, 3, 1, 0)).reshape(9 * c_in, c_out)
    w_flat = jnp.pad(w_flat, ((0, 0), (0, cp - c_out))).astype(compute_dtype)
    return x_pad, w_flat, n, c_in, h, w, c_out, cp


def _conv3x3_pass1(x_pad, w_flat, n, c_in, h, w, cp, tc, th, y_dtype,
                   vmem_limit, with_stats):
    num_ct = cp // tc
    num_rt = h // th
    grid = (n, num_ct, num_rt)             # image / C_out tile / row tile (innermost)
    in_specs = [
        # whole padded image stays resident while the inner axes iterate
        pl.BlockSpec((1, h + 2, w + 2, c_in), lambda i, j, r: (i, 0, 0, 0)),
        # weight tile stays resident across the row-tile axis
        pl.BlockSpec((9 * c_in, tc), lambda i, j, r: (0, j)),
    ]
    y_spec = pl.BlockSpec((th, w, tc), lambda i, j, r: (i * num_rt + r, 0, j))
    y_shape = jax.ShapeDtypeStruct((n * h, w, cp), y_dtype)
    params = pltpu.CompilerParams(
        dimension_semantics=("parallel", "parallel", "parallel"),
        vmem_limit_bytes=vmem_limit)
    if with_stats:
        stat_spec = pl.BlockSpec((1, 1, tc), lambda i, j, r: (i * num_rt + r, 0, j))
        stat_shape = jax.ShapeDtypeStruct((n * num_rt, 1, cp), jnp.float32)
        return pl.pallas_call(
            _conv_bn_stats_kernel,
            out_shape=(y_shape, stat_shape, stat_shape),
            grid=grid, in_specs=in_specs,
            out_specs=(y_spec, stat_spec, stat_spec),
            compiler_params=params,
        )(x_pad, w_flat)
    return pl.pallas_call(
        _conv_relu_kernel,
        out_shape=y_shape, grid=grid, in_specs=in_specs, out_specs=y_spec,
        compiler_params=params,
    )(x_pad, w_flat)


def _finalize(out_flat, n, h, w, c_out, cp, channels_last):
    out = out_flat.reshape(n, h, w, cp)
    if cp != c_out:
        out = out[..., :c_out]
    if channels_last:
        return out
    return jnp.transpose(out, (0, 3, 1, 2))


def conv_relu_2d(x, weight, *, compute_dtype=jnp.bfloat16, out_dtype=None,
                 channels_last=False, row_tile=None, cout_tile=None):
    """ConvRelu block: Conv2d 3x3 / stride 1 / pad 1 / no bias, fused ReLU."""
    vmem_limit, cout_prefs = _tpu_defaults()
    budget = int(vmem_limit * 0.7)
    out_dtype = x.dtype if out_dtype is None else out_dtype

    x_pad, w_flat, n, c_in, h, w, c_out, cp = _prep_inputs(
        x, weight, compute_dtype, channels_last)
    in_bytes = jnp.dtype(compute_dtype).itemsize
    out_bytes = jnp.dtype(out_dtype).itemsize

    tc = cout_tile if cout_tile is not None else _pick_cout_tile(cp, cout_prefs)
    assert cp % tc == 0 and tc % _LANE == 0
    th = row_tile if row_tile is not None else _pick_row_tile(
        h, w, c_in, tc, in_bytes, out_bytes, budget)
    assert h % th == 0

    out_flat = _conv3x3_pass1(x_pad, w_flat, n, c_in, h, w, cp, tc, th,
                              out_dtype, vmem_limit, with_stats=False)
    return _finalize(out_flat, n, h, w, c_out, cp, channels_last)


def conv_bn_2d(x, weight, gamma, beta, *, relu=False,
               compute_dtype=jnp.bfloat16, out_dtype=None, channels_last=False,
               row_tile=None, cout_tile=None):
    """Conv2d 3x3 / stride 1 / pad 1 / no bias + BatchNorm2d with batch statistics
    (PyTorch training-mode forward), optional fused trailing ReLU."""
    vmem_limit, cout_prefs = _tpu_defaults()
    budget = int(vmem_limit * 0.7)
    out_dtype = x.dtype if out_dtype is None else out_dtype

    x_pad, w_flat, n, c_in, h, w, c_out, cp = _prep_inputs(
        x, weight, compute_dtype, channels_last)
    in_bytes = jnp.dtype(compute_dtype).itemsize
    y_dtype = compute_dtype                # bf16 intermediate halves the HBM round trip
    y_bytes = jnp.dtype(y_dtype).itemsize

    tc = cout_tile if cout_tile is not None else _pick_cout_tile(cp, cout_prefs)
    assert cp % tc == 0 and tc % _LANE == 0
    th = row_tile if row_tile is not None else _pick_row_tile(
        h, w, c_in, tc, in_bytes, y_bytes, budget)
    assert h % th == 0

    # ---- pass 1: conv strips + per-tile partial channel sums ------------------
    y_flat, psum, pssq = _conv3x3_pass1(
        x_pad, w_flat, n, c_in, h, w, cp, tc, th, y_dtype, vmem_limit,
        with_stats=True)

    # ---- finalize BN statistics once (O(tiles*C) glue), fold into scale/shift --
    # TODO(synk): E[x^2]-E[x]^2 in f32 can lose precision for very large N*H*W;
    # switch to a shifted/two-pass variance if tighter BN tolerances are needed.
    cnt = float(n * h * w)
    mean = jnp.sum(psum, axis=(0, 1)) / cnt
    var = jnp.maximum(jnp.sum(pssq, axis=(0, 1)) / cnt - mean * mean, 0.0)
    inv = lax.rsqrt(var + BN_EPS)
    gamma_p = jnp.pad(gamma.astype(jnp.float32).reshape(-1), (0, cp - c_out))
    beta_p = jnp.pad(beta.astype(jnp.float32).reshape(-1), (0, cp - c_out))
    scale = (gamma_p * inv).reshape(1, cp)
    shift = (beta_p - mean * gamma_p * inv).reshape(1, cp)

    # ---- pass 2: per-channel scale/shift (+ fused ReLU), row-tiled --------------
    r2 = n * h
    out_bytes = jnp.dtype(out_dtype).itemsize
    tr = _largest_divisor_leq(
        r2, budget // max(1, 2 * w * cp * (y_bytes + out_bytes)))
    out_flat = pl.pallas_call(
        functools.partial(_scale_shift_kernel, relu=relu),
        out_shape=jax.ShapeDtypeStruct((r2, w, cp), out_dtype),
        grid=(r2 // tr,),
        in_specs=[
            pl.BlockSpec((tr, w, cp), lambda i: (i, 0, 0)),
            pl.BlockSpec((1, cp), lambda i: (0, 0)),
            pl.BlockSpec((1, cp), lambda i: (0, 0)),
        ],
        out_specs=pl.BlockSpec((tr, w, cp), lambda i: (i, 0, 0)),
        compiler_params=pltpu.CompilerParams(
            dimension_semantics=("parallel",),
            vmem_limit_bytes=vmem_limit),
    )(y_flat, scale, shift)

    return _finalize(out_flat, n, h, w, c_out, cp, channels_last)


# ----------------------------------------------------------------------------- #
# plain-JAX references
# ----------------------------------------------------------------------------- #
def _conv_ref(x, weight):
    return lax.conv_general_dilated(
        x, weight, window_strides=(1, 1), padding=((1, 1), (1, 1)),
        dimension_numbers=("NCHW", "OIHW", "NCHW"),
        precision=lax.Precision.HIGHEST)


def _reference_conv_bn(x, weight, gamma, beta, relu=False):
    y = _conv_ref(x, weight)
    mean = jnp.mean(y, axis=(0, 2, 3), keepdims=True)
    var = jnp.mean((y - mean) ** 2, axis=(0, 2, 3), keepdims=True)
    out = (y - mean) * lax.rsqrt(var + BN_EPS) * gamma.reshape(1, -1, 1, 1) \
        + beta.reshape(1, -1, 1, 1)
    return jnp.maximum(out, 0.0) if relu else out


def _reference_conv_relu(x, weight):
    return jnp.maximum(_conv_ref(x, weight), 0.0)


# ----------------------------------------------------------------------------- #
if __name__ == "__main__":
    key = jax.random.PRNGKey(0)
    kx, kw, kx7, kw7 = jax.random.split(key, 4)

    N, C_in, H, W = 2, 4, 16, 16
    C_out = 8

    x = jax.random.normal(kx, (N, C_in, H, W), dtype=jnp.float32)
    bound = 1.0 / jnp.sqrt(C_in * 9)
    weight = jax.random.uniform(kw, (C_out, C_in, 3, 3), jnp.float32, -bound, bound)
    gamma = jnp.linspace(0.5, 1.5, C_out).astype(jnp.float32)
    beta = jnp.linspace(-0.2, 0.2, C_out).astype(jnp.float32)

    ref_bn = _reference_conv_bn(x, weight, gamma, beta)
    ref_bn_relu = _reference_conv_bn(x, weight, gamma, beta, relu=True)
    ref_relu = _reference_conv_relu(x, weight)

    # conv+BN, exact f32 path
    out_f32 = jax.block_until_ready(
        conv_bn_2d(x, weight, gamma, beta, compute_dtype=jnp.float32))
    assert out_f32.shape == (N, C_out, H, W)
    assert jnp.allclose(out_f32, ref_bn, atol=1e-3, rtol=1e-3), "conv_bn f32 mismatch"

    # conv+BN, default bf16 MXU path (f32 accumulation / statistics)
    out_bf16 = jax.block_until_ready(conv_bn_2d(x, weight, gamma, beta))
    assert jnp.allclose(out_bf16, ref_bn, atol=5e-2, rtol=5e-2), "conv_bn bf16 mismatch"

    # conv+BN+fused ReLU, forcing the multi-row-tile grid (dynamic strip slicing)
    out_bnr = jax.block_until_ready(
        conv_bn_2d(x, weight, gamma, beta, relu=True,
                   compute_dtype=jnp.float32, row_tile=4))
    assert jnp.allclose(out_bnr, ref_bn_relu, atol=1e-3, rtol=1e-3), \
        "conv_bn fused-relu / row-tiled mismatch"

    # ConvRelu building block (f32 path)
    out_cr = jax.block_until_ready(conv_relu_2d(x, weight, compute_dtype=jnp.float32))
    assert out_cr.shape == (N, C_out, H, W)
    assert jnp.allclose(out_cr, ref_relu, atol=1e-3, rtol=1e-3), "conv_relu mismatch"

    # channels_last end-to-end (NHWC in, NHWC out)
    x_nhwc = jnp.transpose(x, (0, 2, 3, 1))
    out_cl = jax.block_until_ready(
        conv_relu_2d(x_nhwc, weight, compute_dtype=jnp.float32, channels_last=True))
    assert jnp.allclose(out_cl, jnp.transpose(ref_relu, (0, 2, 3, 1)),
                        atol=1e-3, rtol=1e-3), "channels_last mismatch"

    # odd spatial size (encoder-style 7x7) + multiple C_out tiles (num_ct = 2)
    x7 = jax.random.normal(kx7, (N, C_in, 7, 7), dtype=jnp.float32)
    w7 = jax.random.uniform(kw7, (256, C_in, 3, 3), jnp.float32, -bound, bound)
    g7 = jnp.linspace(0.5, 1.5, 256).astype(jnp.float32)
    b7 = jnp.linspace(-0.2, 0.2, 256).astype(jnp.float32)

    out7_relu = jax.block_until_ready(
        conv_relu_2d(x7, w7, compute_dtype=jnp.float32, cout_tile=128))
    assert jnp.allclose(out7_relu, _reference_conv_relu(x7, w7),
                        atol=1e-3, rtol=1e-3), "7x7 conv_relu mismatch"

    out7_bn = jax.block_until_ready(
        conv_bn_2d(x7, w7, g7, b7, compute_dtype=jnp.float32, cout_tile=128))
    assert jnp.allclose(out7_bn, _reference_conv_bn(x7, w7, g7, b7),
                        atol=1e-3, rtol=1e-3), "7x7 conv_bn mismatch"

    print("KERNEL_OK")
</pallas_src>

<mosaic_0001>
module attributes {stable_mosaic.version = 11 : i64} {
  func.func @_conv_bn_stats_kernel(%arg0: i32, %arg1: i32, %arg2: i32, %arg3: memref<1x18x18x4xf32, #tpu.memory_space<vmem>>, %arg4: memref<36x128xf32, #tpu.memory_space<vmem>>, %arg5: memref<16x16x128xf32, #tpu.memory_space<vmem>>, %arg6: memref<1x1x128xf32, #tpu.memory_space<vmem>>, %arg7: memref<1x1x128xf32, #tpu.memory_space<vmem>>) attributes {dimension_semantics = [#tpu.dimension_semantics<parallel>, #tpu.dimension_semantics<parallel>, #tpu.dimension_semantics<parallel>], iteration_bounds = array<i64: 2, 1, 1>, scalar_prefetch = 0 : i64, scratch_operands = 0 : i64, tpu.core_type = #tpu.core_type<tc>, window_params = [{transform_indices = @transform_0, window_bounds = array<i64: 1, 18, 18, 4>}, {transform_indices = @transform_1, window_bounds = array<i64: 36, 128>}, {transform_indices = @transform_2, window_bounds = array<i64: 16, 16, 128>}, {transform_indices = @transform_3, window_bounds = array<i64: 1, 1, 128>}, {transform_indices = @transform_4, window_bounds = array<i64: 1, 1, 128>}]} {
    %c0 = arith.constant 0 : index
    %c0_0 = arith.constant 0 : index
    %c0_1 = arith.constant 0 : index
    %c0_2 = arith.constant 0 : index
    %0 = vector.load %arg3[%c0, %c0_0, %c0_1, %c0_2] : memref<1x18x18x4xf32, #tpu.memory_space<vmem>>, vector<1x18x18x4xf32>
    %1 = vector.shape_cast %0 : vector<1x18x18x4xf32> to vector<18x18x4xf32>
    %2 = vector.extract_strided_slice %1 {offsets = [0, 0, 0], sizes = [16, 16, 4], strides = [1, 1, 1]} : vector<18x18x4xf32> to vector<16x16x4xf32>
    %3 = vector.shape_cast %2 : vector<16x16x4xf32> to vector<256x4xf32>
    %4 = vector.extract_strided_slice %1 {offsets = [0, 1, 0], sizes = [16, 16, 4], strides = [1, 1, 1]} : vector<18x18x4xf32> to vector<16x16x4xf32>
    %5 = vector.shape_cast %4 : vector<16x16x4xf32> to vector<256x4xf32>
    %6 = vector.extract_strided_slice %1 {offsets = [0, 2, 0], sizes = [16, 16, 4], strides = [1, 1, 1]} : vector<18x18x4xf32> to vector<16x16x4xf32>
    %7 = vector.shape_cast %6 : vector<16x16x4xf32> to vector<256x4xf32>
    %8 = vector.extract_strided_slice %1 {offsets = [1, 0, 0], sizes = [16, 16, 4], strides = [1, 1, 1]} : vector<18x18x4xf32> to vector<16x16x4xf32>
    %9 = vector.shape_cast %8 : vector<16x16x4xf32> to vector<256x4xf32>
    %10 = vector.extract_strided_slice %1 {offsets = [1, 1, 0], sizes = [16, 16, 4], strides = [1, 1, 1]} : vector<18x18x4xf32> to vector<16x16x4xf32>
    %11 = vector.shape_cast %10 : vector<16x16x4xf32> to vector<256x4xf32>
    %12 = vector.extract_strided_slice %1 {offsets = [1, 2, 0], sizes = [16, 16, 4], strides = [1, 1, 1]} : vector<18x18x4xf32> to vector<16x16x4xf32>
    %13 = vector.shape_cast %12 : vector<16x16x4xf32> to vector<256x4xf32>
    %14 = vector.extract_strided_slice %1 {offsets = [2, 0, 0], sizes = [16, 16, 4], strides = [1, 1, 1]} : vector<18x18x4xf32> to vector<16x16x4xf32>
    %15 = vector.shape_cast %14 : vector<16x16x4xf32> to vector<256x4xf32>
    %16 = vector.extract_strided_slice %1 {offsets = [2, 1, 0], sizes = [16, 16, 4], strides = [1, 1, 1]} : vector<18x18x4xf32> to vector<16x16x4xf32>
    %17 = vector.shape_cast %16 : vector<16x16x4xf32> to vector<256x4xf32>
    %18 = vector.extract_strided_slice %1 {offsets = [2, 2, 0], sizes = [16, 16, 4], strides = [1, 1, 1]} : vector<18x18x4xf32> to vector<16x16x4xf32>
    %19 = vector.shape_cast %18 : vector<16x16x4xf32> to vector<256x4xf32>
    %20 = tpu.concatenate %3, %5, %7, %9, %11, %13, %15, %17, %19 in 1 : vector<256x4xf32>, vector<256x4xf32>, vector<256x4xf32>, vector<256x4xf32>, vector<256x4xf32>, vector<256x4xf32>, vector<256x4xf32>, vector<256x4xf32>, vector<256x4xf32> -> vector<256x36xf32>
    %c0_3 = arith.constant 0 : index
    %c0_4 = arith.constant 0 : index
    %21 = vector.load %arg4[%c0_3, %c0_4] : memref<36x128xf32, #tpu.memory_space<vmem>>, vector<36x128xf32>
    %cst = arith.constant dense<0.000000e+00> : vector<256x128xf32>
    %22 = tpu.matmul %20, %21, %cst {dimension_numbers = #tpu.dot_dimension_numbers<[1], [0], [0], [1], [0, 0, 1, 1], [], []>} : vector<256x36xf32>, vector<36x128xf32>, vector<256x128xf32> -> vector<256x128xf32>
    %23 = vector.shape_cast %22 : vector<256x128xf32> to vector<16x16x128xf32>
    %c0_5 = arith.constant 0 : index
    %c0_6 = arith.constant 0 : index
    %c0_7 = arith.constant 0 : index
    %24 = vector.load %arg5[%c0_5, %c0_6, %c0_7] : memref<16x16x128xf32, #tpu.memory_space<vmem>>, vector<16x16x128xf32>
    tpu.vector_store %arg5[%c0_5, %c0_6, %c0_7], %23 {strides = array<i32>} : memref<16x16x128xf32, #tpu.memory_space<vmem>>, vector<16x16x128xf32>,
    %cst_8 = arith.constant dense<0.000000e+00> : vector<128xf32>
    %25 = vector.multi_reduction <add>, %22, %cst_8 [0] : vector<256x128xf32> to vector<128xf32>
    %26 = vector.shape_cast %25 : vector<128xf32> to vector<1x128xf32>
    %27 = vector.shape_cast %26 : vector<1x128xf32> to vector<1x1x128xf32>
    %c0_9 = arith.constant 0 : index
    %c0_10 = arith.constant 0 : index
    %c0_11 = arith.constant 0 : index
    %28 = vector.load %arg6[%c0_9, %c0_10, %c0_11] : memref<1x1x128xf32, #tpu.memory_space<vmem>>, vector<1x1x128xf32>
    tpu.vector_store %arg6[%c0_9, %c0_10, %c0_11], %27 {strides = array<i32>} : memref<1x1x128xf32, #tpu.memory_space<vmem>>, vector<1x1x128xf32>,
    %29 = arith.mulf %22, %22 : vector<256x128xf32>
    %cst_12 = arith.constant dense<0.000000e+00> : vector<128xf32>
    %30 = vector.multi_reduction <add>, %29, %cst_12 [0] : vector<256x128xf32> to vector<128xf32>
    %31 = vector.shape_cast %30 : vector<128xf32> to vector<1x128xf32>
    %32 = vector.shape_cast %31 : vector<1x128xf32> to vector<1x1x128xf32>
    %c0_13 = arith.constant 0 : index
    %c0_14 = arith.constant 0 : index
    %c0_15 = arith.constant 0 : index
    %33 = vector.load %arg7[%c0_13, %c0_14, %c0_15] : memref<1x1x128xf32, #tpu.memory_space<vmem>>, vector<1x1x128xf32>
    tpu.vector_store %arg7[%c0_13, %c0_14, %c0_15], %32 {strides = array<i32>} : memref<1x1x128xf32, #tpu.memory_space<vmem>>, vector<1x1x128xf32>,
    return
  }
  func.func @transform_0(%arg0: i32, %arg1: i32, %arg2: i32) -> (i32, i32, i32, i32) {
    %c0_i32 = arith.constant 0 : i32
    %c0_i32_0 = arith.constant 0 : i32
    %c0_i32_1 = arith.constant 0 : i32
    %c0_i32_2 = arith.constant 0 : i32
    return %arg0, %c0_i32, %c0_i32_0, %c0_i32_1 : i32, i32, i32, i32
  }
  func.func @transform_1(%arg0: i32, %arg1: i32, %arg2: i32) -> (i32, i32) {
    %c0_i32 = arith.constant 0 : i32
    %c0_i32_0 = arith.constant 0 : i32
    return %c0_i32, %arg1 : i32, i32
  }
  func.func @transform_2(%arg0: i32, %arg1: i32, %arg2: i32) -> (i32, i32, i32) {
    %c1_i32 = arith.constant 1 : i32
    %0 = arith.muli %arg0, %c1_i32 : i32
    %1 = arith.addi %0, %arg2 : i32
    %c0_i32 = arith.constant 0 : i32
    %c0_i32_0 = arith.constant 0 : i32
    return %1, %c0_i32, %arg1 : i32, i32, i32
  }
  func.func @transform_3(%arg0: i32, %arg1: i32, %arg2: i32) -> (i32, i32, i32) {
    %c1_i32 = arith.constant 1 : i32
    %0 = arith.muli %arg0, %c1_i32 : i32
    %1 = arith.addi %0, %arg2 : i32
    %c0_i32 = arith.constant 0 : i32
    %c0_i32_0 = arith.constant 0 : i32
    return %1, %c0_i32, %arg1 : i32, i32, i32
  }
  func.func @transform_4(%arg0: i32, %arg1: i32, %arg2: i32) -> (i32, i32, i32) {
    %c1_i32 = arith.constant 1 : i32
    %0 = arith.muli %arg0, %c1_i32 : i32
    %1 = arith.addi %0, %arg2 : i32
    %c0_i32 = arith.constant 0 : i32
    %c0_i32_0 = arith.constant 0 : i32
    return %1, %c0_i32, %arg1 : i32, i32, i32
  }
}

</mosaic_0001>

<bundles_post_ra>
// kernel: tpu_custom_call.1
= control target key start
LH: loop header
LB: loop body
LE: loop exit
PB: predicated region body
PF: predicated region fallthrough
CT: control target
= control target key end

     0   :  { %10 = vsyncpa [#allocation3], 0  ;;  %s4421_s0 = inlined_call_operand.vmem [shape: f32[2,18,18,4], index: 0, kind: input, shape index: {}]   ;;  %s4422_s1 = inlined_call_operand.vmem [shape: f32[36,128], index: 1, kind: input, shape index: {}]   ;;  %s4423_s2 = inlined_call_operand.hbm [shape: f32[32,16,128], index: 2, kind: output, shape index: {0}]   ;;  %s4424_s3 = inlined_call_operand.hbm [shape: f32[2,1,128], index: 3, kind: output, shape index: {1}]   ;;  %s4425_s4 = inlined_call_operand.hbm [shape: f32[2,1,128], index: 4, kind: output, shape index: {2}]  }
   0x1   :  { %12 = vsyncpa [#allocation3 + $0x1], 0 }
   0x2   :  { %13 = vsyncpa [#allocation5], 0 }
   0x3   :  { %15 = vsyncpa [#allocation5 + $0x1], 0  ;;  %s2690_s15 = smov 0   ;;  %s2692_s16 = smov 0  }
   0x4   :  { %s2694_s17 = smov 0   ;;  %s2696_s18 = smov 0  }
   0x5   :  { %s2698_s19 = smov 0   ;;  %s2700_s20 = smov 0  }
   0x6 LB: > { %s2260_s21 = sadd.s32 4294967295, %s2651_s20   ;;  %s2261_s22 = sadd.s32 4294967294, %s2651_s20   ;;  %s2651_s20 = sphi %s2700_s20, %s21_s20   ;;  %s2647_s19 = sphi %s2698_s19, %s4643_s19   ;;  %s2643_s18 = sphi %s2696_s18, %s4642_s18   ;;  %s2639_s17 = sphi %s2694_s17, %s4641_s17   ;;  %s2635_s16 = sphi %s2692_s16, %s4640_s16   ;;  %s2631_s15 = sphi %s2690_s15, %s4639_s15  }
   0x7   : > { %s40_s23 = sadd.s32 1, %s2647_s19  ;;  %s103_s24 = sadd.s32 1, %s2639_s17 }
   0x8   : > { %p42_p0 = scmp.ge.s32.totalorder %s40_s23, 2  ;;  %p113_p1 = scmp.ne.s32.totalorder %s2639_s17, %s2635_s16 }
   0x9   : > { %p114_p2 = scmp.eq.s32.totalorder %s2260_s21, 1  ;;  %p119_p3 = scmp.ne.s32.totalorder %s2635_s16, %s2631_s15 }
   0xa   : > { %s4645_s23 = smov (%p42_p0, %s40_s23), 0  ;;  %p120_p5 = scmp.eq.s32.totalorder %s2261_s22, 1 }
   0xb   : > { %p2732_p4 = por %p114_p2, %p113_p1  ;;  %s98_s26 = ssub.s32 %s2647_s19, %s4645_s23 }
   0xc   : > { %p2265_p6 = scmp.ge.s32.totalorder %s2651_s20, 1  ;;  %p101_p7 = scmp.eq.s32.totalorder %s98_s26, 0 }
   0xd   : > { %p2741_p8 = por %p120_p5, %p119_p3  ;;  %p213_p9 = scmp.lt.s32.totalorder %s2651_s20, 3 }
   0xe   : > { %s2747_s28 = scalar_select %p101_p7, %s2639_s17, %s103_s24  }
   0xf   : > { %p214_p10 = pnand %p2265_p6, %p213_p9 }
  0x11   : > { %217 = sbr.rel (%p214_p10) target bundleno = 937 (0x3a9), region = 28 }
  0x18   : > { %p251_p11 = scmp.lt.s32.totalorder %s2643_s18, 1  ;;  %vm366_vm0 = vcmask 1046528   ;;  %s2653_s8 = smov 4   ;;  %vm447_vm1 = vcmask 1045504   ;;  %vm1688_vm2 = vcmask 1043456   ;;  %vm1322_vm3 = vcmask 31744  }
  0x19   : > { %s2654_s9 = smov 8   ;;  %s2655_s10 = smov 12   ;;  %vm1355_vm4 = vcmask 64512   ;;  %vm1388_vm5 = vcmask 97280   ;;  %vm1421_vm6 = vcmask 130048   ;;  %vm1454_vm7 = vcmask 162816  }
  0x1a   : > { %s252_s29 = scalar_select %p251_p11, %s2643_s18, 1  ;;  %vm1487_vm8 = vcmask 195584   ;;  %vm1520_vm9 = vcmask 228352   ;;  %vm1553_vm10 = vcmask 261120   ;;  %vm1591_vm11 = vcmask 293888  }
  0x1b   : > { %s2656_s11 = smov 16   ;;  %s2657_s26 = smov 20  }
  0x1c   : > { %s2420_s30 = smul.u32 432, %s252_s29  ;;  %s2659_s14 = smov 28  }
  0x1d   : > { %s2660_s24 = smov 32   ;;  %s2661_s13 = smov [#allocation2]  }
  0x1e   : > { %s2754_s7 = scalar_lea.vmem %s4421_s0, %s2420_s30 }
  0x1f   : > { %v2757_v0 = vld [vmem:[%s2754_s7 + $0x18] sm:$0xff]  ;;  %v2760_v1 = vld [vmem:[%s2754_s7 + $0x20] sm:$0xff]  ;;  %v2768_v5 = vld [vmem:[%s2754_s7 + $0x8] sm:$0xff] }
  0x20   : > { %v2763_v2 = vld [vmem:[%s2754_s7] sm:$0xff]  ;;  %v372_v3 = vrot.slane %v2757_v0, 1  ;;  %v373_v4 = vrot.slane %v2760_v1, 1  ;;  %v2772_v7 = vld [vmem:[%s2754_s7 + $0x28] sm:$0x3]  ;;  %v368_v8 = vrot.slane %v2768_v5, 1 }
  0x21   : > { %4521 = vst [vmem:[#allocation9_spill] sm:$0xff] %v2763_v2  ;;  %v367_v6 = vrot.slane %v2763_v2, 1  ;;  %v375_v9 = vrot.slane %v2772_v7, 1  ;;  %v2777_v10 = vld [vmem:[%s2754_s7 + $0x10] sm:$0x3]  ;;  %v2780_v11 = vld [vmem:[%s2754_s7 + $0x38] sm:$0xff] }
  0x22   : > { %v2783_v12 = vsel %vm366_vm0, %v372_v3, %v373_v4  ;;  %v370_v13 = vrot.slane %v2777_v10, 1  ;;  %v2787_v14 = vld [vmem:[%s2754_s7 + $0x40] sm:$0x3]  ;;  %v2790_v15 = vld [vmem:[%s2754_s7 + $0x30] sm:$0xff]  ;;  %v378_v18 = vrot.slane %v2780_v11, 1  ;;  %v2810_v24 = vld [vmem:[%s2754_s7 + $0x48] sm:$0xff] }
  0x23   : > { %558 = vrot.lane.b32.xlu1 %v2783_v12, %s2653_s8  ;;  %v369_v16 = vsel %vm366_vm0, %v367_v6, %v368_v8  ;;  %v2797_v17 = vsel %vm366_vm0, %v373_v4, %v375_v9  ;;  %v380_v19 = vrot.slane %v2787_v14, 1  ;;  %v377_v21 = vrot.slane %v2790_v15, 1  ;;  %v2804_v22 = vld [vmem:[%s2754_s7 + $0x50] sm:$0xff]  ;;  %v2807_v23 = vld [vmem:[%s2754_s7 + $0x58] sm:$0x3]  ;;  %v2825_v30 = vld [vmem:[%s2754_s7 + $0x68] sm:$0xff] }
  0x24   : > { %554 = vrot.lane.b32.xlu0 %v369_v16, %s2653_s8  ;;  %v371_v20 = vsel %vm366_vm0, %v368_v8, %v370_v13  ;;  %v383_v26 = vrot.slane %v2804_v22, 1  ;;  %v385_v27 = vrot.slane %v2807_v23, 1  ;;  %v382_v29 = vrot.slane %v2810_v24, 1  ;;  %v2828_v31 = vld [vmem:[%s2754_s7 + $0x70] sm:$0x3]  ;;  %v2831_v32 = vld [vmem:[%s2754_s7 + $0x60] sm:$0xff] }
  0x25   : > { %v2816_v25 = vsel %vm366_vm0, %v378_v18, %v380_v19  ;;  %v2821_v28 = vsel %vm366_vm0, %v377_v21, %v378_v18  ;;  %v388_v34 = vrot.slane %v2825_v30, 1  ;;  %v390_v35 = vrot.slane %v2828_v31, 1  ;;  %v2847_v38 = vld [vmem:[%s2754_s7 + $0x80] sm:$0xff]  ;;  %v2850_v39 = vld [vmem:[%s2754_s7 + $0x88] sm:$0x3]  ;;  %v2853_v40 = vld [vmem:[%s2754_s7 + $0x78] sm:$0xff] }
  0x26   : > { %v2838_v33 = vsel %vm366_vm0, %v383_v26, %v385_v27  ;;  %v2843_v36 = vsel %vm366_vm0, %v382_v29, %v383_v26  ;;  %v387_v37 = vrot.slane %v2831_v32, 1  ;;  %v393_v42 = vrot.slane %v2847_v38, 1  ;;  %v2869_v46 = vld [vmem:[%s2754_s7 + $0x98] sm:$0xff]  ;;  %v2872_v47 = vld [vmem:[%s2754_s7 + $0xa0] sm:$0x3]  ;;  %v2875_v48 = vld [vmem:[%s2754_s7 + $0x90] sm:$0xff] }
  0x27   : > { %560 = vrot.lane.b32.xlu1 %v2797_v17, %s2653_s8  ;;  %4522 = vst [vmem:[#allocation10_spill] sm:$0xff] %v2838_v33  ;;  %v2860_v41 = vsel %vm366_vm0, %v388_v34, %v390_v35  ;;  %v395_v43 = vrot.slane %v2850_v39, 1  ;;  %v392_v45 = vrot.slane %v2853_v40, 1  ;;  %v398_v50 = vrot.slane %v2869_v46, 1  ;;  %v2891_v54 = vld [vmem:[%s2754_s7 + $0xb0] sm:$0xff]  ;;  %v2897_v56 = vld [vmem:[%s2754_s7 + $0xa8] sm:$0xff] }
  0x28   : > { %556 = vrot.lane.b32.xlu0 %v371_v20, %s2653_s8  ;;  %4523 = vst [vmem:[#allocation11_spill] sm:$0xff] %v2860_v41  ;;  %v2865_v44 = vsel %vm366_vm0, %v387_v37, %v388_v34  ;;  %v400_v51 = vrot.slane %v2872_v47, 1  ;;  %v397_v53 = vrot.slane %v2875_v48, 1  ;;  %v2894_v55 = vld [vmem:[%s2754_s7 + $0xb8] sm:$0x3]  ;;  %v403_v58 = vrot.slane %v2891_v54, 1 }
  0x29   : > { %4524 = vst [vmem:[#allocation12_spill] sm:$0xff] %v2865_v44  ;;  %v2882_v49 = vsel %vm366_vm0, %v393_v42, %v395_v43  ;;  %v2887_v52 = vsel %vm366_vm0, %v392_v45, %v393_v42  ;;  %v405_v59 = vrot.slane %v2894_v55, 1  ;;  %v402_v61 = vrot.slane %v2897_v56, 1  ;;  %v2913_v62 = vld [vmem:[%s2754_s7 + $0xc8] sm:$0xff]  ;;  %v2916_v63 = vld [vmem:[%s2754_s7 + $0xd0] sm:$0x3] }
  0x2a   : > { %4525 = vst [vmem:[#allocation13_spill] sm:$0xff] %v2882_v49  ;;  %4526 = vst [vmem:[#allocation14_spill] sm:$0xff] %v2887_v52  ;;  %v2904_v57 = vsel %vm366_vm0, %v398_v50, %v400_v51  ;;  %v2909_v60 = vsel %vm366_vm0, %v397_v53, %v398_v50  ;;  %v2919_v3 = vld [vmem:[%s2754_s7 + $0xc0] sm:$0xff]  ;;  %v408_v6 = vrot.slane %v2913_v62, 1  ;;  %v410_v8 = vrot.slane %v2916_v63, 1  ;;  %v2941_v19 = vld [vmem:[%s2754_s7 + $0xd8] sm:$0xff] }
  0x2b   : > { %564 = vrot.lane.b32.xlu1 %v2816_v25, %s2653_s8  ;;  %4527 = vst [vmem:[#allocation15_spill] sm:$0xff] %v2904_v57  ;;  %4528 = vst [vmem:[#allocation16_spill] sm:$0xff] %v2909_v60  ;;  %v2926_v4 = vsel %vm366_vm0, %v403_v58, %v405_v59  ;;  %v2931_v9 = vsel %vm366_vm0, %v402_v61, %v403_v58  ;;  %v407_v13 = vrot.slane %v2919_v3, 1  ;;  %v2935_v16 = vld [vmem:[%s2754_s7 + $0xe0] sm:$0xff]  ;;  %v2938_v18 = vld [vmem:[%s2754_s7 + $0xe8] sm:$0x3] }
  0x2c   : > { %562 = vrot.lane.b32.xlu0 %v2821_v28, %s2653_s8  ;;  %4529 = vst [vmem:[#allocation17_spill] sm:$0xff] %v2926_v4  ;;  %4530 = vst [vmem:[#allocation18_spill] sm:$0xff] %v2931_v9  ;;  %v2948_v20 = vsel %vm366_vm0, %v408_v6, %v410_v8  ;;  %v413_v21 = vrot.slane %v2935_v16, 1  ;;  %v415_v26 = vrot.slane %v2938_v18, 1  ;;  %v412_v29 = vrot.slane %v2941_v19, 1  ;;  %v2957_v34 = vld [vmem:[%s2754_s7 + $0xf8] sm:$0xff] }
  0x2d   : > { %4531 = vst [vmem:[#allocation19_spill] sm:$0xff] %v2948_v20  ;;  %v2953_v27 = vsel %vm366_vm0, %v407_v13, %v408_v6  ;;  %v2960_v35 = vld [vmem:[%s2754_s7 + $0x100] sm:$0x3]  ;;  %v2963_v37 = vld [vmem:[%s2754_s7 + $0xf0] sm:$0xff]  ;;  %v418_v43 = vrot.slane %v2957_v34, 1  ;;  %v2985_v59 = vld [vmem:[%s2754_s7 + $0x108] sm:$0xff] }
  0x2e   : > { %4532 = vst [vmem:[#allocation20_spill] sm:$0xff] %v2953_v27  ;;  %v2970_v42 = vsel %vm366_vm0, %v413_v21, %v415_v26  ;;  %v420_v45 = vrot.slane %v2960_v35, 1  ;;  %v2975_v50 = vsel %vm366_vm0, %v412_v29, %v413_v21  ;;  %v417_v51 = vrot.slane %v2963_v37, 1  ;;  %v2979_v53 = vld [vmem:[%s2754_s7 + $0x110] sm:$0xff]  ;;  %v2982_v58 = vld [vmem:[%s2754_s7 + $0x118] sm:$0x3] }
  0x2f   : > { %568 = vrot.lane.b32.xlu1 %v2838_v33, %s2653_s8  ;;  %4533 = vst [vmem:[#allocation21_spill] sm:$0xff] %v2970_v42  ;;  %4534 = vst [vmem:[#allocation22_spill] sm:$0xff] %v2975_v50  ;;  %v423_v6 = vrot.slane %v2979_v53, 1  ;;  %v425_v8 = vrot.slane %v2982_v58, 1  ;;  %v422_v21 = vrot.slane %v2985_v59, 1  ;;  %v3001_v26 = vld [vmem:[%s2754_s7 + $0x128] sm:$0xff] }
  0x30   : > { %566 = vrot.lane.b32.xlu0 %v2843_v36, %s2653_s8  ;;  %v2992_v61 = vsel %vm366_vm0, %v418_v43, %v420_v45  ;;  %v2997_v13 = vsel %vm366_vm0, %v417_v51, %v418_v43  ;;  %v3004_v29 = vld [vmem:[%s2754_s7 + $0x130] sm:$0x3]  ;;  %v428_v43 = vrot.slane %v3001_v26, 1 }
  0x31   : > { %4535 = vst [vmem:[#allocation23_spill] sm:$0xff] %v2992_v61  ;;  %4536 = vst [vmem:[#allocation24_spill] sm:$0xff] %v2997_v13  ;;  %v3014_v45 = vsel %vm366_vm0, %v423_v6, %v425_v8  ;;  %v430_v51 = vrot.slane %v3004_v29, 1 }
  0x32   : > { %4537 = vst [vmem:[#allocation25_spill] sm:$0xff] %v3014_v45 }
  0x33   : > { %572 = vrot.lane.b32.xlu1 %v2860_v41, %s2653_s8  ;;  %v3036_v8 = vsel %vm366_vm0, %v428_v43, %v430_v51  ;;  %v3070_v41 = vld [vmem:[%s2754_s7 + $0x178] sm:$0x3] }
  0x34   : > { %570 = vrot.lane.b32.xlu0 %v2865_v44, %s2653_s8  ;;  %4539 = vst [vmem:[#allocation27_spill] sm:$0xff] %v3036_v8 }
  0x37   : > { %576 = vrot.lane.b32.xlu1 %v2882_v49, %s2653_s8 }
  0x38   : > { %574 = vrot.lane.b32.xlu0 %v2887_v52, %s2653_s8  ;;  %v3067_v52 = vld [vmem:[%s2754_s7 + $0x170] sm:$0xff] }
  0x3b   : > { %580 = vrot.lane.b32.xlu1 %v2904_v57, %s2653_s8  ;;  %v3045_v57 = vld [vmem:[%s2754_s7 + $0x158] sm:$0xff] }
  0x3c   : > { %578 = vrot.lane.b32.xlu0 %v2909_v60, %s2653_s8 }
  0x3f   : > { %584 = vrot.lane.b32.xlu1 %v2926_v4, %s2653_s8 }
  0x40   : > { %582 = vrot.lane.b32.xlu0 %v2931_v9, %s2653_s8 }
  0x43   : > { %588 = vrot.lane.b32.xlu1 %v2948_v20, %s2653_s8 }
  0x44   : > { %586 = vrot.lane.b32.xlu0 %v2953_v27, %s2653_s8  ;;  %v3023_v27 = vld [vmem:[%s2754_s7 + $0x140] sm:$0xff] }
  0x47   : > { %592 = vrot.lane.b32.xlu1 %v2970_v42, %s2653_s8  ;;  %v3007_v42 = vld [vmem:[%s2754_s7 + $0x120] sm:$0xff] }
  0x48   : > { %590 = vrot.lane.b32.xlu0 %v2975_v50, %s2653_s8  ;;  %v3019_v50 = vsel %vm366_vm0, %v422_v21, %v423_v6  ;;  %v427_v20 = vrot.slane %v3007_v42, 1  ;;  %v433_v6 = vrot.slane %v3023_v27, 1 }
  0x49   : > { %4538 = vst [vmem:[#allocation26_spill] sm:$0xff] %v3019_v50 }
  0x4a   : > { %v3041_v4 = vsel %vm366_vm0, %v427_v20, %v428_v43  ;;  %v438_v20 = vrot.slane %v3045_v57, 1 }
  0x4b   : > { %596 = vrot.lane.b32.xlu1 %v2992_v61, %s2653_s8  ;;  %v3026_v61 = vld [vmem:[%s2754_s7 + $0x148] sm:$0x3]  ;;  %4540 = vst [vmem:[#allocation28_spill] sm:$0xff] %v3041_v4 }
  0x4c   : > { %594 = vrot.lane.b32.xlu0 %v2997_v13, %s2653_s8  ;;  %v3029_v13 = vld [vmem:[%s2754_s7 + $0x138] sm:$0xff]  ;;  %v435_v21 = vrot.slane %v3026_v61, 1 }
  0x4d   : > { %v432_v9 = vrot.slane %v3029_v13, 1 }
  0x4e   : > { %v3058_v51 = vsel %vm366_vm0, %v433_v6, %v435_v21 }
  0x4f   : > { %600 = vrot.lane.b32.xlu1 %v3014_v45, %s2653_s8  ;;  %v3048_v45 = vld [vmem:[%s2754_s7 + $0x160] sm:$0x3]  ;;  %4541 = vst [vmem:[#allocation29_spill] sm:$0xff] %v3058_v51  ;;  %v3063_v60 = vsel %vm366_vm0, %v432_v9, %v433_v6  ;;  %v443_v9 = vrot.slane %v3067_v52, 1  ;;  %v445_v6 = vrot.slane %v3070_v41, 1 }
  0x50   : > { %598 = vrot.lane.b32.xlu0 %v3019_v50, %s2653_s8  ;;  %v3051_v50 = vld [vmem:[%s2754_s7 + $0x150] sm:$0xff]  ;;  %v440_v43 = vrot.slane %v3048_v45, 1  ;;  %4542 = vst [vmem:[#allocation30_spill] sm:$0xff] %v3063_v60 }
  0x51   : > { %v437_v49 = vrot.slane %v3051_v50, 1 }
  0x52   : > { %v3080_v21 = vsel %vm366_vm0, %v438_v20, %v440_v43  ;;  %v449_v43 = vrot.slane %v2768_v5, 2  ;;  %v456_v5 = vrot.slane %v2772_v7, 2  ;;  %v458_v7 = vrot.slane %v2790_v15, 2 }
  0x53   : > { %604 = vrot.lane.b32.xlu1 %v3036_v8, %s2653_s8  ;;  %v3073_v8 = vld [vmem:[%s2754_s7 + $0x168] sm:$0xff]  ;;  %4543 = vst [vmem:[#allocation31_spill] sm:$0xff] %v3080_v21 }
  0x54   : > { %602 = vrot.lane.b32.xlu0 %v3041_v4, %s2653_s8  ;;  %v3085_v4 = vsel %vm366_vm0, %v437_v49, %v438_v20  ;;  %v442_v44 = vrot.slane %v3073_v8, 1  ;;  %v448_v49 = vrot.slane %v2763_v2, 2  ;;  %v491_v2 = vrot.slane %v2916_v63, 2 }
  0x55   : > { %4544 = vst [vmem:[#allocation32_spill] sm:$0xff] %v3085_v4 }
  0x56   : > { %v3098_v33 = vsel %vm366_vm0, %v442_v44, %v443_v9  ;;  %v453_v44 = vrot.slane %v2757_v0, 2 }
  0x57   : > { %608 = vrot.lane.b32.xlu1 %v3058_v51, %s2653_s8  ;;  %v3093_v51 = vsel %vm366_vm0, %v443_v9, %v445_v6  ;;  %4546 = vst [vmem:[#allocation34_spill] sm:$0xff] %v3098_v33  ;;  %v454_v6 = vrot.slane %v2760_v1, 2 }
  0x58   : > { %606 = vrot.lane.b32.xlu0 %v3063_v60, %s2653_s8  ;;  %4545 = vst [vmem:[#allocation33_spill] sm:$0xff] %v3093_v51  ;;  %v451_v60 = vrot.slane %v2777_v10, 2  ;;  %v450_v10 = vsel %vm447_vm1, %v448_v49, %v449_v43  ;;  %v464_v49 = vrot.slane %v2804_v22, 2 }
  0x59   : > { %v3113_v9 = vsel %vm447_vm1, %v454_v6, %v456_v5 }
  0x5a   : > { %v452_v20 = vsel %vm447_vm1, %v449_v43, %v451_v60  ;;  %v461_v60 = vrot.slane %v2787_v14, 2 }
  0x5b   : > { %612 = vrot.lane.b32.xlu1 %v3080_v21, %s2653_s8  ;;  %v481_v21 = vrot.slane %v2872_v47, 2 }
  0x5c   : > { %610 = vrot.lane.b32.xlu0 %v3085_v4, %s2653_s8  ;;  %v486_v4 = vrot.slane %v2894_v55, 2 }
  0x5f   : > { %616 = vrot.lane.b32.xlu1 %v3093_v51, %s2653_s8  ;;  %v459_v51 = vrot.slane %v2780_v11, 2 }
  0x60   : > { %614 = vrot.lane.b32.xlu0 %v3098_v33, %s2653_s8  ;;  %v3118_v33 = vsel %vm447_vm1, %v453_v44, %v454_v6  ;;  %v463_v6 = vrot.slane %v2810_v24, 2  ;;  %v471_v44 = vrot.slane %v2828_v31, 2  ;;  %s2658_s8 = smov 24  }
  0x61   : > { %v3126_v43 = vsel %vm447_vm1, %v459_v51, %v461_v60  ;;  %v3131_v14 = vsel %vm447_vm1, %v458_v7, %v459_v51  ;;  %v468_v51 = vrot.slane %v2831_v32, 2  ;;  %v474_v7 = vrot.slane %v2847_v38, 2 }
  0x63   : > { %652 = vrot.lane.b32.xlu1 %v452_v20, %s2654_s9  ;;  %v466_v20 = vrot.slane %v2807_v23, 2  ;;  %v3144_v23 = vsel %vm447_vm1, %v463_v6, %v464_v49 }
  0x64   : > { %650 = vrot.lane.b32.xlu0 %v450_v10, %s2654_s9  ;;  %v469_v10 = vrot.slane %v2825_v30, 2 }
  0x65   : > { %v3139_v5 = vsel %vm447_vm1, %v464_v49, %v466_v20  ;;  %v476_v20 = vrot.slane %v2850_v39, 2  ;;  %v473_v49 = vrot.slane %v2853_v40, 2 }
  0x66   : > { %v3152_v60 = vsel %vm447_vm1, %v469_v10, %v471_v44  ;;  %v3157_v31 = vsel %vm447_vm1, %v468_v51, %v469_v10  ;;  %v479_v44 = vrot.slane %v2869_v46, 2  ;;  %v478_v10 = vrot.slane %v2875_v48, 2 }
  0x67   : > { %656 = vrot.lane.b32.xlu1 %v3113_v9, %s2654_s9  ;;  %v3165_v6 = vsel %vm447_vm1, %v474_v7, %v476_v20  ;;  %v3170_v39 = vsel %vm447_vm1, %v473_v49, %v474_v7  ;;  %v484_v20 = vrot.slane %v2891_v54, 2  ;;  %v483_v7 = vrot.slane %v2897_v56, 2 }
  0x68   : > { %654 = vrot.lane.b32.xlu0 %v3118_v33, %s2654_s9  ;;  %4547 = vst [vmem:[#allocation35_spill] sm:$0xff] %v3165_v6  ;;  %v3178_v51 = vsel %vm447_vm1, %v479_v44, %v481_v21  ;;  %v3183_v47 = vsel %vm447_vm1, %v478_v10, %v479_v44  ;;  %v489_v21 = vrot.slane %v2913_v62, 2  ;;  %v488_v44 = vrot.slane %v2919_v3, 2 }
  0x69   : > { %4548 = vst [vmem:[#allocation36_spill] sm:$0xff] %v3178_v51  ;;  %4549 = vst [vmem:[#allocation37_spill] sm:$0xff] %v3183_v47  ;;  %v3191_v49 = vsel %vm447_vm1, %v484_v20, %v486_v4  ;;  %v3196_v55 = vsel %vm447_vm1, %v483_v7, %v484_v20  ;;  %v494_v4 = vrot.slane %v2935_v16, 2  ;;  %v493_v20 = vrot.slane %v2941_v19, 2 }
  0x6a   : > { %4550 = vst [vmem:[#allocation38_spill] sm:$0xff] %v3191_v49  ;;  %4551 = vst [vmem:[#allocation39_spill] sm:$0xff] %v3196_v55  ;;  %v3204_v10 = vsel %vm447_vm1, %v489_v21, %v491_v2  ;;  %v3209_v63 = vsel %vm447_vm1, %v488_v44, %v489_v21  ;;  %v499_v2 = vrot.slane %v2957_v34, 2  ;;  %v498_v21 = vrot.slane %v2963_v37, 2 }
  0x6b   : > { %660 = vrot.lane.b32.xlu1 %v3126_v43, %s2654_s9  ;;  %4552 = vst [vmem:[#allocation40_spill] sm:$0xff] %v3204_v10  ;;  %4553 = vst [vmem:[#allocation41_spill] sm:$0xff] %v3209_v63 }
  0x6c   : > { %658 = vrot.lane.b32.xlu0 %v3131_v14, %s2654_s9 }
  0x6f   : > { %664 = vrot.lane.b32.xlu1 %v3139_v5, %s2654_s9 }
  0x70   : > { %662 = vrot.lane.b32.xlu0 %v3144_v23, %s2654_s9 }
  0x73   : > { %668 = vrot.lane.b32.xlu1 %v3152_v60, %s2654_s9 }
  0x74   : > { %666 = vrot.lane.b32.xlu0 %v3157_v31, %s2654_s9 }
  0x77   : > { %672 = vrot.lane.b32.xlu1 %v3165_v6, %s2654_s9 }
  0x78   : > { %670 = vrot.lane.b32.xlu0 %v3170_v39, %s2654_s9 }
  0x7b   : > { %676 = vrot.lane.b32.xlu1 %v3178_v51, %s2654_s9  ;;  %v496_v51 = vrot.slane %v2938_v18, 2  ;;  %v3222_v18 = vsel %vm447_vm1, %v493_v20, %v494_v4 }
  0x7c   : > { %674 = vrot.lane.b32.xlu0 %v3183_v47, %s2654_s9  ;;  %4555 = vst [vmem:[#allocation43_spill] sm:$0xff] %v3222_v18 }
  0x7d   : > { %v3217_v7 = vsel %vm447_vm1, %v494_v4, %v496_v51  ;;  %v504_v51 = vrot.slane %v2979_v53, 2  ;;  %v503_v4 = vrot.slane %v2985_v59, 2 }
  0x7e   : > { %4554 = vst [vmem:[#allocation42_spill] sm:$0xff] %v3217_v7 }
  0x7f   : > { %680 = vrot.lane.b32.xlu1 %v3191_v49, %s2654_s9  ;;  %v501_v49 = vrot.slane %v2960_v35, 2  ;;  %v3235_v35 = vsel %vm447_vm1, %v498_v21, %v499_v2 }
  0x80   : > { %678 = vrot.lane.b32.xlu0 %v3196_v55, %s2654_s9  ;;  %4557 = vst [vmem:[#allocation45_spill] sm:$0xff] %v3235_v35 }
  0x81   : > { %v3230_v44 = vsel %vm447_vm1, %v499_v2, %v501_v49  ;;  %v509_v49 = vrot.slane %v3001_v26, 2  ;;  %v508_v2 = vrot.slane %v3007_v42, 2 }
  0x82   : > { %4556 = vst [vmem:[#allocation44_spill] sm:$0xff] %v3230_v44 }
  0x83   : > { %684 = vrot.lane.b32.xlu1 %v3204_v10, %s2654_s9  ;;  %v506_v10 = vrot.slane %v2982_v58, 2  ;;  %v3248_v58 = vsel %vm447_vm1, %v503_v4, %v504_v51 }
  0x84   : > { %682 = vrot.lane.b32.xlu0 %v3209_v63, %s2654_s9  ;;  %4559 = vst [vmem:[#allocation47_spill] sm:$0xff] %v3248_v58  ;;  %v1587_v63 = vld [vmem:[%s4422_s1 + $0x8] sm:$0xff] }
  0x85   : > { %v3243_v20 = vsel %vm447_vm1, %v504_v51, %v506_v10  ;;  %v514_v10 = vrot.slane %v3023_v27, 2  ;;  %v513_v51 = vrot.slane %v3029_v13, 2 }
  0x86   : > { %4558 = vst [vmem:[#allocation46_spill] sm:$0xff] %v3243_v20 }
  0x87   : > { %688 = vrot.lane.b32.xlu1 %v3217_v7, %s2654_s9  ;;  %v511_v7 = vrot.slane %v3004_v29, 2  ;;  %v3261_v29 = vsel %vm447_vm1, %v508_v2, %v509_v49 }
  0x88   : > { %686 = vrot.lane.b32.xlu0 %v3222_v18, %s2654_s9  ;;  %4561 = vst [vmem:[#allocation49_spill] sm:$0xff] %v3261_v29 }
  0x89   : > { %v3256_v21 = vsel %vm447_vm1, %v509_v49, %v511_v7  ;;  %v519_v7 = vrot.slane %v3045_v57, 2  ;;  %v518_v49 = vrot.slane %v3051_v50, 2 }
  0x8a   : > { %4560 = vst [vmem:[#allocation48_spill] sm:$0xff] %v3256_v21 }
  0x8b   : > { %692 = vrot.lane.b32.xlu1 %v3230_v44, %s2654_s9  ;;  %v516_v44 = vrot.slane %v3026_v61, 2  ;;  %v3276_v61 = vsel %vm447_vm1, %v513_v51, %v514_v10  ;;  %v523_v51 = vrot.slane %v3073_v8, 2 }
  0x8c   : > { %690 = vrot.lane.b32.xlu0 %v3235_v35, %s2654_s9  ;;  %4564 = vst [vmem:[#allocation52_spill] sm:$0xff] %v3276_v61 }
  0x8d   : > { %v3269_v4 = vsel %vm447_vm1, %v514_v10, %v516_v44  ;;  %v3293_v10 = vsel %vm447_vm1, %v518_v49, %v519_v7 }
  0x8e   : > { %4562 = vst [vmem:[#allocation50_spill] sm:$0xff] %v3269_v4  ;;  %4568 = vst [vmem:[#allocation56_spill] sm:$0xff] %v3293_v10 }
  0x8f   : > { %696 = vrot.lane.b32.xlu1 %v3243_v20, %s2654_s9  ;;  %v521_v20 = vrot.slane %v3048_v45, 2  ;;  %v524_v45 = vrot.slane %v3067_v52, 2 }
  0x90   : > { %694 = vrot.lane.b32.xlu0 %v3248_v58, %s2654_s9 }
  0x91   : > { %v3286_v44 = vsel %vm447_vm1, %v519_v7, %v521_v20 }
  0x92   : > { %4566 = vst [vmem:[#allocation54_spill] sm:$0xff] %v3286_v44 }
  0x93   : > { %700 = vrot.lane.b32.xlu1 %v3256_v21, %s2654_s9  ;;  %v526_v21 = vrot.slane %v3070_v41, 2  ;;  %v3308_v41 = vsel %vm447_vm1, %v523_v51, %v524_v45 }
  0x94   : > { %698 = vrot.lane.b32.xlu0 %v3261_v29, %s2654_s9  ;;  %4572 = vst [vmem:[#allocation60_spill] sm:$0xff] %v3308_v41 }
  0x95   : > { %v3273_v58 = vpop.permute.xlu1 %558  ;;  %v3303_v20 = vsel %vm447_vm1, %v524_v45, %v526_v21 }
  0x96   : > { %4563 = vst [vmem:[#allocation51_spill] sm:$0xff] %v3273_v58  ;;  %v3279_v2 = vpop.permute.xlu0 %554  ;;  %4570 = vst [vmem:[#allocation58_spill] sm:$0xff] %v3303_v20  ;;  %v1586_v58 = vld [vmem:[%s4422_s1] sm:$0xff] }
  0x97   : > { %4565 = vst [vmem:[#allocation53_spill] sm:$0xff] %v3279_v2  ;;  %704 = vrot.lane.b32.xlu1 %v3269_v4, %s2654_s9 }
  0x98   : > { %702 = vrot.lane.b32.xlu0 %v3276_v61, %s2654_s9 }
  0x99   : > { %v3290_v29 = vpop.permute.xlu1 %560 }
  0x9a   : > { %4567 = vst [vmem:[#allocation55_spill] sm:$0xff] %v3290_v29  ;;  %v3296_v35 = vpop.permute.xlu0 %556 }
  0x9b   : > { %4569 = vst [vmem:[#allocation57_spill] sm:$0xff] %v3296_v35  ;;  %708 = vrot.lane.b32.xlu1 %v3286_v44, %s2654_s9  ;;  %v2406_v35 = vpack.c.bf16 %v1587_v63, %v1586_v58 }
  0x9c   : > { %706 = vrot.lane.b32.xlu0 %v3293_v10, %s2654_s9 }
  0x9d   : > { %v3305_v4 = vpop.permute.xlu1 %564  ;;  %2407 = vmatprep.subr.bf16.mxu0 %v2406_v35  ;;  %2414 = vmatprep.subr.bf16.mxu1 %v2406_v35 }
  0x9e   : > { %4571 = vst [vmem:[#allocation59_spill] sm:$0xff] %v3305_v4  ;;  %v3310_v7 = vpop.permute.xlu0 %562  ;;  %2409 = vmatpush3.bf16.msra.mxu0 %v2406_v35  ;;  %2417 = vmatpush3.bf16.msra.mxu1 %v2406_v35 }
  0x9f   : > { %4573 = vst [vmem:[#allocation61_spill] sm:$0xff] %v3310_v7  ;;  %712 = vrot.lane.b32.xlu1 %v3303_v20, %s2654_s9 }
  0xa0   : > { %710 = vrot.lane.b32.xlu0 %v3308_v41, %s2654_s9 }
  0xa1   : > { %v3316_v49 = vpop.permute.xlu1 %568 }
  0xa2   : > { %v3318_v44 = vpop.permute.xlu0 %566 }
  0xa3   : > { %4574 = vst [vmem:[#allocation62_spill] sm:$0xff] %v3318_v44  ;;  %748 = vrot.lane.b32.xlu1 %v2760_v1, %s2655_s10 }
  0xa4   : > { %746 = vrot.lane.b32.xlu0 %v2757_v0, %s2655_s10 }
  0xa5   : > { %v3324_v21 = vpop.permute.xlu1 %572 }
  0xa6   : > { %v3326_v45 = vpop.permute.xlu0 %570 }
  0xa7   : > { %752 = vrot.lane.b32.xlu1 %v2780_v11, %s2655_s10 }
  0xa8   : > { %750 = vrot.lane.b32.xlu0 %v2790_v15, %s2655_s10 }
  0xa9   : > { %v3332_v51 = vpop.permute.xlu1 %576 }
  0xaa   : > { %v3334_v20 = vpop.permute.xlu0 %574 }
  0xab   : > { %756 = vrot.lane.b32.xlu1 %v2804_v22, %s2655_s10 }
  0xac   : > { %754 = vrot.lane.b32.xlu0 %v2810_v24, %s2655_s10 }
  0xad   : > { %v3340_v0 = vpop.permute.xlu1 %580 }
  0xae   : > { %v3342_v1 = vpop.permute.xlu0 %578 }
  0xaf   : > { %760 = vrot.lane.b32.xlu1 %v2825_v30, %s2655_s10 }
  0xb0   : > { %758 = vrot.lane.b32.xlu0 %v2831_v32, %s2655_s10 }
  0xb1   : > { %v3348_v41 = vpop.permute.xlu1 %584 }
  0xb2   : > { %v3350_v10 = vpop.permute.xlu0 %582 }
  0xb3   : > { %764 = vrot.lane.b32.xlu1 %v2847_v38, %s2655_s10 }
  0xb4   : > { %762 = vrot.lane.b32.xlu0 %v2853_v40, %s2655_s10 }
  0xb5   : > { %v3356_v61 = vpop.permute.xlu1 %588 }
  0xb6   : > { %v3358_v44 = vpop.permute.xlu0 %586 }
  0xb7   : > { %768 = vrot.lane.b32.xlu1 %v2869_v46, %s2655_s10 }
  0xb8   : > { %766 = vrot.lane.b32.xlu0 %v2875_v48, %s2655_s10 }
  0xb9   : > { %v3364_v4 = vpop.permute.xlu1 %592 }
  0xba   : > { %v3366_v18 = vpop.permute.xlu0 %590 }
  0xbb   : > { %772 = vrot.lane.b32.xlu1 %v2891_v54, %s2655_s10 }
  0xbc   : > { %770 = vrot.lane.b32.xlu0 %v2897_v56, %s2655_s10 }
  0xbd   : > { %v3372_v7 = vpop.permute.xlu1 %596 }
  0xbe   : > { %v3374_v29 = vpop.permute.xlu0 %594 }
  0xbf   : > { %844 = vrot.lane.b32.xlu1 %v2797_v17, %s2656_s11  ;;  %v1588_v17 = vld [vmem:[%s4422_s1 + $0x10] sm:$0xff] }
  0xc0   : > { %842 = vrot.lane.b32.xlu0 %v2783_v12, %s2656_s11  ;;  %v1589_v12 = vld [vmem:[%s4422_s1 + $0x18] sm:$0xff] }
  0xc1   : > { %v3386_v2 = vpop.permute.xlu1 %600  ;;  %v2410_v63 = vpack.c.bf16 %v1589_v12, %v1588_v17 }
  0xc2   : > { %v3388_v55 = vpop.permute.xlu0 %598 }
  0xc3   : > { %940 = vrot.lane.b32.xlu1 %v3113_v9, %s2657_s26  ;;  %2411 = vmatprep.subr.bf16.mxu0 %v2410_v63 }
  0xc4   : > { %938 = vrot.lane.b32.xlu0 %v3118_v33, %s2657_s26  ;;  %2415 = vmatprep.subr.bf16.mxu1 %v2410_v63  ;;  %v1590_v33 = vld [vmem:[%s4422_s1 + $0x20] sm:$0xf] }
  0xc5   : > { %v3400_v58 = vpop.permute.xlu1 %604  ;;  %2413 = vmatpush3.bf16.msra.mxu0 %v2410_v63  ;;  %2418 = vmatpush3.bf16.msra.mxu1 %v2410_v63 }
  0xc6   : > { %v3402_v47 = vpop.permute.xlu0 %602  ;;  %2356 = vmatprep.subr.msk.mxu0 %vm1688_vm2, %v1590_v33  ;;  %2416 = vmatprep.subr.msk.mxu1 %vm1688_vm2, %v1590_v33 }
  0xc7   : > { %1036 = vrot.lane.b32.xlu1 %v2780_v11, %s2658_s8 }
  0xc8   : > { %1034 = vrot.lane.b32.xlu0 %v2790_v15, %s2658_s8 }
  0xc9   : > { %v3411_v9 = vpop.permute.xlu1 %608  ;;  %2357 = vmatpush3.msk.msra.mxu0 %vm1688_vm2, %v1590_v33  ;;  %2419 = vmatpush3.msk.msra.mxu1 %vm1688_vm2, %v1590_v33 }
  0xca   : > { %v3413_v35 = vpop.permute.xlu0 %606 }
  0xcb   : > { %846 = vrot.lane.b32.xlu1 %v2821_v28, %s2656_s11 }
  0xcc   : > { %1130 = vrot.lane.b32.xlu0 %v2821_v28, %s2659_s14 }
  0xcd   : > { %v3419_v11 = vpop.permute.xlu1 %612 }
  0xce   : > { %v3421_v15 = vpop.permute.xlu0 %610 }
  0xcf   : > { %1226 = vrot.lane.b32.xlu1 %v3131_v14, %s2660_s24 }
  0xd0   : > { %1132 = vrot.lane.b32.xlu0 %v2816_v25, %s2659_s14 }
  0xd1   : > { %v3427_v17 = vpop.permute.xlu1 %616 }
  0xd2   : > { %v3429_v12 = vpop.permute.xlu0 %614 }
  0xd3   : > { %942 = vrot.lane.b32.xlu1 %v3131_v14, %s2657_s26 }
  0xd4   : > { %848 = vrot.lane.b32.xlu0 %v2816_v25, %s2656_s11 }
  0xd5   : > { %v3435_v28 = vpop.permute.xlu1 %652 }
  0xd6   : > { %v3437_v63 = vpop.permute.xlu0 %650 }
  0xd7   : > { %944 = vrot.lane.b32.xlu1 %v3126_v43, %s2657_s26 }
  0xd8   : > { %1228 = vrot.lane.b32.xlu0 %v3126_v43, %s2660_s24  ;;  %v1330_v43 = vsel %vm1322_vm3, %v2804_v22, %v3316_v49 }
  0xd9   : > { %v3443_v33 = vpop.permute.xlu1 %656 }
  0xda   : > { %4575 = vst [vmem:[#allocation63_spill] sm:$0xff] %v3443_v33  ;;  %v3445_v6 = vpop.permute.xlu0 %654 }
  0xdb   : > { %4576 = vst [vmem:[#allocation64_spill] sm:$0xff] %v3445_v6  ;;  %1040 = vrot.lane.b32.xlu1 %v2804_v22, %s2658_s8  ;;  %v1331_v22 = vsel %vm1322_vm3, %v2831_v32, %v3326_v45  ;;  %v1333_v45 = vsel %vm1322_vm3, %v2853_v40, %v3334_v20 }
  0xdc   : > { %1038 = vrot.lane.b32.xlu0 %v2810_v24, %s2658_s8 }
  0xdd   : > { %v3451_v25 = vpop.permute.xlu1 %660 }
  0xde   : > { %4577 = vst [vmem:[#allocation65_spill] sm:$0xff] %v3451_v25  ;;  %v3453_v14 = vpop.permute.xlu0 %658  ;;  %v4580_v25 = vld [vmem:[#allocation10_spill] sm:$0xff] }
  0xdf   : > { %4578 = vst [vmem:[#allocation66_spill] sm:$0xff] %v3453_v14  ;;  %850 = vrot.lane.b32.xlu1 %v2843_v36, %s2656_s11 }
  0xe0   : > { %1134 = vrot.lane.b32.xlu0 %v2843_v36, %s2659_s14  ;;  %v1332_v36 = vsel %vm1322_vm3, %v2825_v30, %v3324_v21  ;;  %v1334_v21 = vsel %vm1322_vm3, %v2847_v38, %v3332_v51 }
  0xe1   : > { %v665_v33 = vpop.permute.xlu1 %664 }
  0xe2   : > { %v3463_v6 = vsel %vm1355_vm4, %v1330_v43, %v665_v33  ;;  %v3465_v24 = vpop.permute.xlu0 %662 }
  0xe3   : > { %4579 = vst [vmem:[#allocation67_spill] sm:$0xff] %v3463_v6  ;;  %1230 = vrot.lane.b32.xlu1 %v3144_v23, %s2660_s24 }
  0xe4   : > { %1136 = vrot.lane.b32.xlu0 %v4580_v25, %s2659_s14 }
  0xe5   : > { %v669_v14 = vpop.permute.xlu1 %668 }
  0xe6   : > { %v3478_v49 = vsel %vm1355_vm4, %v1332_v36, %v669_v14  ;;  %v667_v33 = vpop.permute.xlu0 %666 }
  0xe7   : > { %v3481_v43 = vsel %vm1355_vm4, %v1331_v22, %v667_v33  ;;  %946 = vrot.lane.b32.xlu1 %v3144_v23, %s2657_s26  ;;  %v1336_v23 = vsel %vm1322_vm3, %v2869_v46, %v3340_v0 }
  0xe8   : > { %852 = vrot.lane.b32.xlu0 %v4580_v25, %s2656_s11 }
  0xe9   : > { %v673_v6 = vpop.permute.xlu1 %672 }
  0xea   : > { %v3494_v14 = vsel %vm1355_vm4, %v1334_v21, %v673_v6  ;;  %v671_v36 = vpop.permute.xlu0 %670  ;;  %v1335_v6 = vsel %vm1322_vm3, %v2875_v48, %v3342_v1  ;;  %v1337_v1 = vsel %vm1322_vm3, %v2897_v56, %v3350_v10  ;;  %v1339_v10 = vsel %vm1322_vm3, %v2919_v3, %v3358_v44 }
  0xeb   : > { %v3497_v22 = vsel %vm1355_vm4, %v1333_v45, %v671_v36  ;;  %948 = vrot.lane.b32.xlu1 %v3139_v5, %s2657_s26  ;;  %v1341_v44 = vsel %vm1322_vm3, %v2941_v19, %v3366_v18  ;;  %v1343_v18 = vsel %vm1322_vm3, %v2963_v37, %v3374_v29  ;;  %v1345_v37 = vsel %vm1322_vm3, %v2985_v59, %v3388_v55 }
  0xec   : > { %1232 = vrot.lane.b32.xlu0 %v3139_v5, %s2660_s24  ;;  %v1338_v5 = vsel %vm1322_vm3, %v2891_v54, %v3348_v41  ;;  %v1347_v59 = vsel %vm1322_vm3, %v3007_v42, %v3402_v47  ;;  %v1349_v42 = vsel %vm1322_vm3, %v3029_v13, %v3413_v35  ;;  %v1351_v13 = vsel %vm1322_vm3, %v3051_v50, %v3421_v15 }
  0xed   : > { %v677_v51 = vpop.permute.xlu1 %676  ;;  %v1353_v50 = vsel %vm1322_vm3, %v3073_v8, %v3429_v12  ;;  %v4586_v12 = vld [vmem:[#allocation16_spill] sm:$0xff] }
  0xee   : > { %v3510_v20 = vsel %vm1355_vm4, %v1336_v23, %v677_v51  ;;  %v675_v25 = vpop.permute.xlu0 %674 }
  0xef   : > { %v3513_v33 = vsel %vm1355_vm4, %v1335_v6, %v675_v25  ;;  %1044 = vrot.lane.b32.xlu1 %v2825_v30, %s2658_s8  ;;  %v4581_v30 = vld [vmem:[#allocation12_spill] sm:$0xff]  ;;  %v4582_v25 = vld [vmem:[#allocation11_spill] sm:$0xff] }
  0xf0   : > { %1042 = vrot.lane.b32.xlu0 %v2831_v32, %s2658_s8  ;;  %v1340_v32 = vsel %vm1322_vm3, %v2913_v62, %v3356_v61  ;;  %v1342_v61 = vsel %vm1322_vm3, %v2935_v16, %v3364_v4  ;;  %v1344_v4 = vsel %vm1322_vm3, %v2957_v34, %v3372_v7  ;;  %v1346_v34 = vsel %vm1322_vm3, %v2979_v53, %v3386_v2 }
  0xf1   : > { %v681_v0 = vpop.permute.xlu1 %680  ;;  %v1348_v53 = vsel %vm1322_vm3, %v3001_v26, %v3400_v58 }
  0xf2   : > { %v3526_v21 = vsel %vm1355_vm4, %v1338_v5, %v681_v0  ;;  %v679_v45 = vpop.permute.xlu0 %678 }
  0xf3   : > { %v3529_v36 = vsel %vm1355_vm4, %v1337_v1, %v679_v45  ;;  %854 = vrot.lane.b32.xlu1 %v4581_v30, %s2656_s11 }
  0xf4   : > { %1138 = vrot.lane.b32.xlu0 %v4581_v30, %s2659_s14 }
  0xf5   : > { %v685_v41 = vpop.permute.xlu1 %684 }
  0xf6   : > { %v3542_v23 = vsel %vm1355_vm4, %v1340_v32, %v685_v41  ;;  %v683_v51 = vpop.permute.xlu0 %682 }
  0xf7   : > { %v3545_v6 = vsel %vm1355_vm4, %v1339_v10, %v683_v51  ;;  %1234 = vrot.lane.b32.xlu1 %v3157_v31, %s2660_s24 }
  0xf8   : > { %1140 = vrot.lane.b32.xlu0 %v4582_v25, %s2659_s14 }
  0xf9   : > { %v689_v5 = vpop.permute.xlu1 %688 }
  0xfa   : > { %v3558_v0 = vsel %vm1355_vm4, %v1342_v61, %v689_v5  ;;  %v687_v1 = vpop.permute.xlu0 %686  ;;  %v4584_v5 = vld [vmem:[#allocation13_spill] sm:$0xff] }
  0xfb   : > { %v3561_v45 = vsel %vm1355_vm4, %v1341_v44, %v687_v1  ;;  %950 = vrot.lane.b32.xlu1 %v3157_v31, %s2657_s26 }
  0xfc   : > { %856 = vrot.lane.b32.xlu0 %v4582_v25, %s2656_s11 }
  0xfd   : > { %v693_v30 = vpop.permute.xlu1 %692 }
  0xfe   : > { %v3574_v32 = vsel %vm1355_vm4, %v1344_v4, %v693_v30  ;;  %v691_v41 = vpop.permute.xlu0 %690 }
  0xff   : > { %v3577_v10 = vsel %vm1355_vm4, %v1343_v18, %v691_v41  ;;  %952 = vrot.lane.b32.xlu1 %v3152_v60, %s2657_s26 }
 0x100   : > { %1236 = vrot.lane.b32.xlu0 %v3152_v60, %s2660_s24 }
 0x101   : > { %v697_v31 = vpop.permute.xlu1 %696 }
 0x102   : > { %v3590_v29 = vsel %vm1355_vm4, %v1346_v34, %v697_v31  ;;  %v695_v7 = vpop.permute.xlu0 %694  ;;  %v4587_v31 = vld [vmem:[#allocation37_spill] sm:$0xff] }
 0x103   : > { %v3593_v51 = vsel %vm1355_vm4, %v1345_v37, %v695_v7  ;;  %1048 = vrot.lane.b32.xlu1 %v2847_v38, %s2658_s8  ;;  %v4583_v38 = vld [vmem:[#allocation14_spill] sm:$0xff] }
 0x104   : > { %1046 = vrot.lane.b32.xlu0 %v2853_v40, %s2658_s8  ;;  %v1350_v40 = vsel %vm1322_vm3, %v3023_v27, %v3411_v9  ;;  %v1352_v27 = vsel %vm1322_vm3, %v3045_v57, %v3419_v11  ;;  %v1354_v57 = vsel %vm1322_vm3, %v3067_v52, %v3427_v17 }
 0x105   : > { %v701_v60 = vpop.permute.xlu1 %700 }
 0x106   : > { %v3606_v55 = vsel %vm1355_vm4, %v1348_v53, %v701_v60  ;;  %v699_v2 = vpop.permute.xlu0 %698  ;;  %v4589_v60 = vld [vmem:[#allocation36_spill] sm:$0xff] }
 0x107   : > { %v3609_v25 = vsel %vm1355_vm4, %v1347_v59, %v699_v2  ;;  %858 = vrot.lane.b32.xlu1 %v4583_v38, %s2656_s11 }
 0x108   : > { %1142 = vrot.lane.b32.xlu0 %v4583_v38, %s2659_s14 }
 0x109   : > { %v705_v26 = vpop.permute.xlu1 %704 }
 0x10a   : > { %v3622_v47 = vsel %vm1355_vm4, %v1350_v40, %v705_v26  ;;  %v703_v58 = vpop.permute.xlu0 %702  ;;  %v4590_v26 = vld [vmem:[#allocation18_spill] sm:$0xff] }
 0x10b   : > { %v3625_v61 = vsel %vm1355_vm4, %v1349_v42, %v703_v58  ;;  %1238 = vrot.lane.b32.xlu1 %v3170_v39, %s2660_s24 }
 0x10c   : > { %1144 = vrot.lane.b32.xlu0 %v4584_v5, %s2659_s14 }
 0x10d   : > { %v709_v9 = vpop.permute.xlu1 %708 }
 0x10e   : > { %v3638_v35 = vsel %vm1355_vm4, %v1352_v27, %v709_v9  ;;  %v707_v44 = vpop.permute.xlu0 %706 }
 0x10f   : > { %v3641_v1 = vsel %vm1355_vm4, %v1351_v13, %v707_v44  ;;  %954 = vrot.lane.b32.xlu1 %v3170_v39, %s2657_s26  ;;  %v4585_v39 = vld [vmem:[#allocation35_spill] sm:$0xff]  ;;  %v4593_v44 = vld [vmem:[#allocation53_spill] sm:$0xff] }
 0x110   : > { %860 = vrot.lane.b32.xlu0 %v4584_v5, %s2656_s11  ;;  %v4591_v5 = vld [vmem:[#allocation39_spill] sm:$0xff] }
 0x111   : > { %v713_v11 = vpop.permute.xlu1 %712 }
 0x112   : > { %v3654_v15 = vsel %vm1355_vm4, %v1354_v57, %v713_v11  ;;  %v711_v4 = vpop.permute.xlu0 %710  ;;  %v4594_v57 = vld [vmem:[#allocation9_spill] sm:$0xff] }
 0x113   : > { %v3657_v30 = vsel %vm1355_vm4, %v1353_v50, %v711_v4  ;;  %956 = vrot.lane.b32.xlu1 %v4585_v39, %s2657_s26  ;;  %v1323_v11 = vsel %vm1322_vm3, %v4594_v57, %v4593_v44  ;;  %v4595_v50 = vld [vmem:[#allocation38_spill] sm:$0xff]  ;;  %v4597_v44 = vld [vmem:[#allocation57_spill] sm:$0xff] }
 0x114   : > { %1240 = vrot.lane.b32.xlu0 %v4585_v39, %s2660_s24  ;;  %v1356_v4 = vsel %vm1355_vm4, %v1323_v11, %v3437_v63 }
 0x115   : > { %v3663_v18 = vpop.permute.xlu1 %748 }
 0x116   : > { %v747_v52 = vpop.permute.xlu0 %746 }
 0x117   : > { %1052 = vrot.lane.b32.xlu1 %v2869_v46, %s2658_s8  ;;  %v4588_v46 = vld [vmem:[#allocation15_spill] sm:$0xff]  ;;  %v1389_v39 = vsel %vm1388_vm5, %v1356_v4, %v747_v52 }
 0x118   : > { %1050 = vrot.lane.b32.xlu0 %v2875_v48, %s2658_s8 }
 0x119   : > { %v3669_v8 = vpop.permute.xlu1 %752 }
 0x11a   : > { %v3671_v17 = vpop.permute.xlu0 %750 }
 0x11b   : > { %862 = vrot.lane.b32.xlu1 %v4586_v12, %s2656_s11 }
 0x11c   : > { %1146 = vrot.lane.b32.xlu0 %v4586_v12, %s2659_s14 }
 0x11d   : > { %v3677_v41 = vpop.permute.xlu1 %756 }
 0x11e   : > { %v3679_v34 = vpop.permute.xlu0 %754 }
 0x11f   : > { %1242 = vrot.lane.b32.xlu1 %v4587_v31, %s2660_s24 }
 0x120   : > { %1148 = vrot.lane.b32.xlu0 %v4588_v46, %s2659_s14 }
 0x121   : > { %v3685_v48 = vpop.permute.xlu1 %760 }
 0x122   : > { %v3687_v37 = vpop.permute.xlu0 %758 }
 0x123   : > { %958 = vrot.lane.b32.xlu1 %v4587_v31, %s2657_s26 }
 0x124   : > { %864 = vrot.lane.b32.xlu0 %v4588_v46, %s2656_s11 }
 0x125   : > { %v3693_v7 = vpop.permute.xlu1 %764 }
 0x126   : > { %v3695_v53 = vpop.permute.xlu0 %762 }
 0x127   : > { %960 = vrot.lane.b32.xlu1 %v4589_v60, %s2657_s26 }
 0x128   : > { %1244 = vrot.lane.b32.xlu0 %v4589_v60, %s2660_s24 }
 0x129   : > { %v3701_v59 = vpop.permute.xlu1 %768 }
 0x12a   : > { %v3703_v2 = vpop.permute.xlu0 %766 }
 0x12b   : > { %1056 = vrot.lane.b32.xlu1 %v2891_v54, %s2658_s8  ;;  %v4592_v54 = vld [vmem:[#allocation17_spill] sm:$0xff] }
 0x12c   : > { %1054 = vrot.lane.b32.xlu0 %v2897_v56, %s2658_s8 }
 0x12d   : > { %v3709_v38 = vpop.permute.xlu1 %772 }
 0x12e   : > { %v3711_v40 = vpop.permute.xlu0 %770 }
 0x12f   : > { %866 = vrot.lane.b32.xlu1 %v4590_v26, %s2656_s11 }
 0x130   : > { %1150 = vrot.lane.b32.xlu0 %v4590_v26, %s2659_s14 }
 0x131   : > { %v845_v42 = vpop.permute.xlu1 %844 }
 0x132   : > { %v843_v58 = vpop.permute.xlu0 %842 }
 0x133   : > { %1246 = vrot.lane.b32.xlu1 %v4591_v5, %s2660_s24  ;;  %v1422_v31 = vsel %vm1421_vm6, %v1389_v39, %v843_v58 }
 0x134   : > { %1152 = vrot.lane.b32.xlu0 %v4592_v54, %s2659_s14 }
 0x135   : > { %v941_v27 = vpop.permute.xlu1 %940 }
 0x136   : > { %v939_v56 = vpop.permute.xlu0 %938 }
 0x137   : > { %962 = vrot.lane.b32.xlu1 %v4591_v5, %s2657_s26  ;;  %v1455_v60 = vsel %vm1454_vm7, %v1422_v31, %v939_v56  ;;  %v2495_v56 = vld [vmem:[%s2754_s7 + $0x8] sm:$0xff] }
 0x138   : > { %868 = vrot.lane.b32.xlu0 %v4592_v54, %s2656_s11  ;;  %v4596_v54 = vld [vmem:[#allocation20_spill] sm:$0xff]  ;;  %v1324_v57 = vsel %vm1322_vm3, %v2495_v56, %v4597_v44 }
 0x139   : > { %v1037_v9 = vpop.permute.xlu1 %1036 }
 0x13a   : > { %v1035_v13 = vpop.permute.xlu0 %1034 }
 0x13b   : > { %964 = vrot.lane.b32.xlu1 %v4595_v50, %s2657_s26  ;;  %v1488_v63 = vsel %vm1487_vm8, %v1455_v60, %v1035_v13 }
 0x13c   : > { %1248 = vrot.lane.b32.xlu0 %v4595_v50, %s2660_s24 }
 0x13d   : > { %v847_v12 = vpop.permute.xlu1 %846 }
 0x13e   : > { %v1131_v46 = vpop.permute.xlu0 %1130 }
 0x13f   : > { %774 = vrot.lane.b32.xlu1 %v2919_v3, %s2655_s10  ;;  %v1521_v52 = vsel %vm1520_vm9, %v1488_v63, %v1131_v46  ;;  %v4598_v63 = vld [vmem:[#allocation41_spill] sm:$0xff] }
 0x140   : > { %1058 = vrot.lane.b32.xlu0 %v2919_v3, %s2658_s8  ;;  %v1357_v3 = vsel %vm1355_vm4, %v1324_v57, %v3435_v28 }
 0x141   : > { %v1227_v26 = vpop.permute.xlu1 %1226  ;;  %v1390_v11 = vsel %vm1388_vm5, %v1357_v3, %v3663_v18 }
 0x142   : > { %v1133_v5 = vpop.permute.xlu0 %1132  ;;  %v1554_v58 = vsel %vm1553_vm10, %v1521_v52, %v1227_v26  ;;  %v1423_v4 = vsel %vm1421_vm6, %v1390_v11, %v845_v42  ;;  %v4599_v42 = vld [vmem:[#allocation19_spill] sm:$0xff]  ;;  %v4602_v11 = vld [vmem:[#allocation40_spill] sm:$0xff] }
 0x143   : > { %1154 = vrot.lane.b32.xlu1 %v4596_v54, %s2659_s14  ;;  %2358 = vmatprep.mubr.msk.f32.mxu0 %vm1591_vm11, %v1554_v58  ;;  %v1456_v39 = vsel %vm1454_vm7, %v1423_v4, %v941_v27  ;;  %v2496_v26 = vld [vmem:[%s2754_s7 + $0x18] sm:$0xff] }
 0x144   : > { %1060 = vrot.lane.b32.xlu0 %v2913_v62, %s2658_s8  ;;  %v1489_v31 = vsel %vm1487_vm8, %v1456_v39, %v1037_v9 }
 0x145   : > { %v943_v13 = vpop.permute.xlu1 %942  ;;  %v1522_v28 = vsel %vm1520_vm9, %v1489_v31, %v1133_v5  ;;  %v4601_v5 = vld [vmem:[#allocation64_spill] sm:$0xff] }
 0x146   : > { %v849_v50 = vpop.permute.xlu0 %848 }
 0x147   : > { %870 = vrot.lane.b32.xlu1 %v4596_v54, %s2656_s11 }
 0x148   : > { %776 = vrot.lane.b32.xlu0 %v2913_v62, %s2655_s10  ;;  %v4600_v62 = vld [vmem:[#allocation51_spill] sm:$0xff] }
 0x149   : > { %v945_v46 = vpop.permute.xlu1 %944  ;;  %v1325_v9 = vsel %vm1322_vm3, %v2496_v26, %v4600_v62 }
 0x14a   : > { %v1229_v60 = vpop.permute.xlu0 %1228  ;;  %v1358_v58 = vsel %vm1355_vm4, %v1325_v9, %v4601_v5  ;;  %v4605_v9 = vld [vmem:[#allocation22_spill] sm:$0xff] }
 0x14b   : > { %v1555_v18 = vsel %vm1553_vm10, %v1522_v28, %v1229_v60  ;;  %1250 = vrot.lane.b32.xlu1 %v4598_v63, %s2660_s24  ;;  %v1391_v54 = vsel %vm1388_vm5, %v1358_v58, %v3671_v17 }
 0x14c   : > { %1156 = vrot.lane.b32.xlu0 %v4599_v42, %s2659_s14  ;;  %2359 = vmatmul.mubr.msk.f32.vlgmr.msra.gmra.mrb[0].mxu0 %vm1591_vm11, %v1555_v18  ;;  %v1424_v44 = vsel %vm1421_vm6, %v1391_v54, %v847_v12  ;;  %v2497_v12 = vld [vmem:[%s2754_s7 + $0x20] sm:$0xff]  ;;  %v4604_v18 = vld [vmem:[#allocation63_spill] sm:$0xff] }
 0x14d   : > { %v1041_v27 = vpop.permute.xlu1 %1040  ;;  %v1457_v3 = vsel %vm1454_vm7, %v1424_v44, %v943_v13  ;;  %v4603_v13 = vld [vmem:[#allocation55_spill] sm:$0xff] }
 0x14e   : > { %v1039_v52 = vpop.permute.xlu0 %1038  ;;  %v1326_v60 = vsel %vm1322_vm3, %v2497_v12, %v4603_v13 }
 0x14f   : > { %966 = vrot.lane.b32.xlu1 %v4598_v63, %s2657_s26  ;;  %v1490_v4 = vsel %vm1487_vm8, %v1457_v3, %v1039_v52  ;;  %v1359_v63 = vsel %vm1355_vm4, %v1326_v60, %v4604_v18  ;;  %v4606_v3 = vld [vmem:[#allocation61_spill] sm:$0xff] }
 0x150   : > { %872 = vrot.lane.b32.xlu0 %v4599_v42, %s2656_s11  ;;  %v1392_v52 = vsel %vm1388_vm5, %v1359_v63, %v3669_v8 }
 0x151   : > { %v851_v56 = vpop.permute.xlu1 %850  ;;  %v1425_v62 = vsel %vm1421_vm6, %v1392_v52, %v849_v50 }
 0x152   : > { %v1135_v57 = vpop.permute.xlu0 %1134  ;;  %v1458_v5 = vsel %vm1454_vm7, %v1425_v62, %v945_v46  ;;  %v4611_v62 = vld [vmem:[#allocation59_spill] sm:$0xff] }
 0x153   : > { %968 = vrot.lane.b32.xlu1 %v4602_v11, %s2657_s26  ;;  %v1523_v39 = vsel %vm1520_vm9, %v1490_v4, %v1135_v57  ;;  %v2498_v57 = vld [vmem:[%s2754_s7 + $0x30] sm:$0xff] }
 0x154   : > { %1252 = vrot.lane.b32.xlu0 %v4602_v11, %s2660_s24  ;;  %v4607_v11 = vld [vmem:[#allocation43_spill] sm:$0xff]  ;;  %v4608_v4 = vld [vmem:[#allocation66_spill] sm:$0xff] }
 0x155   : > { %v1231_v31 = vpop.permute.xlu1 %1230 }
 0x156   : > { %v1556_v28 = vsel %vm1553_vm10, %v1523_v39, %v1231_v31  ;;  %v1137_v17 = vpop.permute.xlu0 %1136  ;;  %v4609_v31 = vld [vmem:[#allocation21_spill] sm:$0xff] }
 0x157   : > { %778 = vrot.lane.b32.xlu1 %v2941_v19, %s2655_s10  ;;  %2361 = vmatprep.mubr.msk.f32.mxu0 %vm1591_vm11, %v1556_v28 }
 0x158   : > { %1062 = vrot.lane.b32.xlu0 %v2941_v19, %s2658_s8  ;;  %v1491_v19 = vsel %vm1487_vm8, %v1458_v5, %v1041_v27  ;;  %v1327_v27 = vsel %vm1322_vm3, %v2498_v57, %v4606_v3  ;;  %v4612_v5 = vld [vmem:[#allocation65_spill] sm:$0xff]  ;;  %v2500_v57 = vld [vmem:[%s2754_s7 + $0xf0] sm:$0xff] }
 0x159   : > { %v947_v42 = vpop.permute.xlu1 %946  ;;  %v1524_v54 = vsel %vm1520_vm9, %v1491_v19, %v1137_v17  ;;  %v1360_v39 = vsel %vm1355_vm4, %v1327_v27, %v4608_v4 }
 0x15a   : > { %v853_v26 = vpop.permute.xlu0 %852 }
 0x15b   : > { %1158 = vrot.lane.b32.xlu1 %v4605_v9, %s2659_s14 }
 0x15c   : > { %1064 = vrot.lane.b32.xlu0 %v2935_v16, %s2658_s8 }
 0x15d   : > { %v949_v58 = vpop.permute.xlu1 %948 }
 0x15e   : > { %v1233_v44 = vpop.permute.xlu0 %1232 }
 0x15f   : > { %v1557_v8 = vsel %vm1553_vm10, %v1524_v54, %v1233_v44  ;;  %874 = vrot.lane.b32.xlu1 %v4605_v9, %s2656_s11 }
 0x160   : > { %780 = vrot.lane.b32.xlu0 %v2935_v16, %s2655_s10  ;;  %2362 = vmatmul.mubr.msk.f32.gmra.mrb[2].mxu0 %vm1591_vm11, %v1557_v8  ;;  %v1393_v16 = vsel %vm1388_vm5, %v1360_v39, %v3679_v34 }
 0x161   : > { %v1045_v50 = vpop.permute.xlu1 %1044  ;;  %v1426_v17 = vsel %vm1421_vm6, %v1393_v16, %v851_v56  ;;  %v4610_v56 = vld [vmem:[#allocation42_spill] sm:$0xff] }
 0x162   : > { %v1043_v46 = vpop.permute.xlu0 %1042  ;;  %v1459_v13 = vsel %vm1454_vm7, %v1426_v17, %v947_v42  ;;  %v2499_v42 = vld [vmem:[%s2754_s7 + $0x38] sm:$0xff]  ;;  %v2502_v17 = vld [vmem:[%s2754_s7 + $0x48] sm:$0xff] }
 0x163   : > { %1254 = vrot.lane.b32.xlu1 %v4607_v11, %s2660_s24  ;;  %v1492_v60 = vsel %vm1487_vm8, %v1459_v13, %v1043_v46  ;;  %v1328_v9 = vsel %vm1322_vm3, %v2499_v42, %v4611_v62  ;;  %v4616_v62 = vld [vmem:[#allocation23_spill] sm:$0xff] }
 0x164   : > { %1160 = vrot.lane.b32.xlu0 %v4609_v31, %s2659_s14  ;;  %v1361_v19 = vsel %vm1355_vm4, %v1328_v9, %v4612_v5 }
 0x165   : > { %v855_v28 = vpop.permute.xlu1 %854  ;;  %v1394_v44 = vsel %vm1388_vm5, %v1361_v19, %v3677_v41  ;;  %v4613_v41 = vld [vmem:[#allocation24_spill] sm:$0xff]  ;;  %v4617_v19 = vld [vmem:[#allocation67_spill] sm:$0xff] }
 0x166   : > { %v1139_v12 = vpop.permute.xlu0 %1138  ;;  %v1427_v46 = vsel %vm1421_vm6, %v1394_v44, %v853_v26  ;;  %v2501_v26 = vld [vmem:[%s2754_s7 + $0xf8] sm:$0xff] }
 0x167   : > { %970 = vrot.lane.b32.xlu1 %v4607_v11, %s2657_s26  ;;  %v1525_v18 = vsel %vm1520_vm9, %v1492_v60, %v1139_v12  ;;  %v1460_v3 = vsel %vm1454_vm7, %v1427_v46, %v949_v58  ;;  %v4614_v12 = vld [vmem:[#allocation62_spill] sm:$0xff] }
 0x168   : > { %876 = vrot.lane.b32.xlu0 %v4609_v31, %s2656_s11  ;;  %v1493_v27 = vsel %vm1487_vm8, %v1460_v3, %v1045_v50  ;;  %v1329_v50 = vsel %vm1322_vm3, %v2502_v17, %v4614_v12 }
 0x169   : > { %v1235_v63 = vpop.permute.xlu1 %1234  ;;  %v1362_v13 = vsel %vm1355_vm4, %v1329_v50, %v3465_v24 }
 0x16a   : > { %v1558_v34 = vsel %vm1553_vm10, %v1525_v18, %v1235_v63  ;;  %v1141_v52 = vpop.permute.xlu0 %1140  ;;  %v1395_v60 = vsel %vm1388_vm5, %v1362_v13, %v3687_v37 }
 0x16b   : > { %972 = vrot.lane.b32.xlu1 %v4610_v56, %s2657_s26  ;;  %2364 = vmatprep.mubr.msk.f32.mxu0 %vm1591_vm11, %v1558_v34  ;;  %v1526_v4 = vsel %vm1520_vm9, %v1493_v27, %v1141_v52  ;;  %v1428_v63 = vsel %vm1421_vm6, %v1395_v60, %v855_v28 }
 0x16c   : > { %1256 = vrot.lane.b32.xlu0 %v4610_v56, %s2660_s24  ;;  %v4615_v56 = vld [vmem:[#allocation45_spill] sm:$0xff] }
 0x16d   : > { %v951_v54 = vpop.permute.xlu1 %950 }
 0x16e   : > { %v857_v8 = vpop.permute.xlu0 %856  ;;  %v1461_v52 = vsel %vm1454_vm7, %v1428_v63, %v951_v54  ;;  %v1396_v54 = vsel %vm1388_vm5, %v4617_v19, %v3685_v48 }
 0x16f   : > { %782 = vrot.lane.b32.xlu1 %v2500_v57, %s2655_s10  ;;  %v1429_v46 = vsel %vm1421_vm6, %v1396_v54, %v857_v8 }
 0x170   : > { %1066 = vrot.lane.b32.xlu0 %v2500_v57, %s2658_s8  ;;  %v4618_v57 = vld [vmem:[#allocation44_spill] sm:$0xff] }
 0x171   : > { %v953_v11 = vpop.permute.xlu1 %952 }
 0x172   : > { %v1237_v39 = vpop.permute.xlu0 %1236  ;;  %v1462_v3 = vsel %vm1454_vm7, %v1429_v46, %v953_v11  ;;  %v2505_v46 = vld [vmem:[%s2754_s7 + $0x120] sm:$0xff] }
 0x173   : > { %v1559_v31 = vsel %vm1553_vm10, %v1526_v4, %v1237_v39  ;;  %1162 = vrot.lane.b32.xlu1 %v4613_v41, %s2659_s14 }
 0x174   : > { %1068 = vrot.lane.b32.xlu0 %v2501_v26, %s2658_s8  ;;  %2365 = vmatmul.mubr.msk.f32.gmra.mrb[4].mxu0 %vm1591_vm11, %v1559_v31 }
 0x175   : > { %v1049_v16 = vpop.permute.xlu1 %1048 }
 0x176   : > { %v1047_v58 = vpop.permute.xlu0 %1046  ;;  %v1495_v27 = vsel %vm1487_vm8, %v1462_v3, %v1049_v16  ;;  %v1397_v16 = vsel %vm1388_vm5, %v3481_v43, %v3695_v53  ;;  %v4620_v43 = vld [vmem:[#allocation47_spill] sm:$0xff]  ;;  %v4621_v53 = vld [vmem:[#allocation25_spill] sm:$0xff] }
 0x177   : > { %878 = vrot.lane.b32.xlu1 %v4613_v41, %s2656_s11  ;;  %v1494_v42 = vsel %vm1487_vm8, %v1461_v52, %v1047_v58  ;;  %v2503_v41 = vld [vmem:[%s2754_s7 + $0x108] sm:$0xff]  ;;  %v2504_v58 = vld [vmem:[%s2754_s7 + $0x110] sm:$0xff] }
 0x178   : > { %784 = vrot.lane.b32.xlu0 %v2501_v26, %s2655_s10  ;;  %v4619_v26 = vld [vmem:[#allocation26_spill] sm:$0xff] }
 0x179   : > { %v859_v18 = vpop.permute.xlu1 %858 }
 0x17a   : > { %v1143_v34 = vpop.permute.xlu0 %1142  ;;  %v1430_v12 = vsel %vm1421_vm6, %v1397_v16, %v859_v18 }
 0x17b   : > { %1258 = vrot.lane.b32.xlu1 %v4615_v56, %s2660_s24  ;;  %v1527_v24 = vsel %vm1520_vm9, %v1494_v42, %v1143_v34  ;;  %v1398_v42 = vsel %vm1388_vm5, %v3478_v49, %v3693_v7  ;;  %v4622_v7 = vld [vmem:[#allocation46_spill] sm:$0xff] }
 0x17c   : > { %1164 = vrot.lane.b32.xlu0 %v4616_v62, %s2659_s14 }
 0x17d   : > { %v1239_v9 = vpop.permute.xlu1 %1238 }
 0x17e   : > { %v1560_v5 = vsel %vm1553_vm10, %v1527_v24, %v1239_v9  ;;  %v1145_v37 = vpop.permute.xlu0 %1144 }
 0x17f   : > { %974 = vrot.lane.b32.xlu1 %v4615_v56, %s2657_s26  ;;  %2367 = vmatprep.mubr.msk.f32.mxu0 %vm1591_vm11, %v1560_v5  ;;  %v1528_v39 = vsel %vm1520_vm9, %v1495_v27, %v1145_v37 }
 0x180   : > { %880 = vrot.lane.b32.xlu0 %v4616_v62, %s2656_s11 }
 0x181   : > { %v955_v28 = vpop.permute.xlu1 %954 }
 0x182   : > { %v861_v44 = vpop.permute.xlu0 %860  ;;  %v1463_v13 = vsel %vm1454_vm7, %v1430_v12, %v955_v28  ;;  %v4624_v12 = vld [vmem:[#allocation49_spill] sm:$0xff] }
 0x183   : > { %976 = vrot.lane.b32.xlu1 %v4618_v57, %s2657_s26  ;;  %v1431_v24 = vsel %vm1421_vm6, %v1398_v42, %v861_v44  ;;  %v2507_v42 = vld [vmem:[%s2754_s7 + $0x138] sm:$0xff] }
 0x184   : > { %1260 = vrot.lane.b32.xlu0 %v4618_v57, %s2660_s24  ;;  %v1399_v57 = vsel %vm1388_vm5, %v3497_v22, %v3703_v2 }
 0x185   : > { %v957_v4 = vpop.permute.xlu1 %956 }
 0x186   : > { %v1241_v31 = vpop.permute.xlu0 %1240  ;;  %v1464_v9 = vsel %vm1454_vm7, %v1431_v24, %v957_v4 }
 0x187   : > { %v1561_v48 = vsel %vm1553_vm10, %v1528_v39, %v1241_v31  ;;  %786 = vrot.lane.b32.xlu1 %v2503_v41, %s2655_s10  ;;  %v4623_v31 = vld [vmem:[#allocation28_spill] sm:$0xff] }
 0x188   : > { %1070 = vrot.lane.b32.xlu0 %v2503_v41, %s2658_s8  ;;  %2368 = vmatmul.mubr.msk.f32.gmra.mrb[6].mxu0 %vm1591_vm11, %v1561_v48  ;;  %v2506_v41 = vld [vmem:[%s2754_s7 + $0x128] sm:$0xff] }
 0x189   : > { %v1053_v8 = vpop.permute.xlu1 %1052 }
 0x18a   : > { %v1051_v11 = vpop.permute.xlu0 %1050  ;;  %v1497_v5 = vsel %vm1487_vm8, %v1464_v9, %v1053_v8 }
 0x18b   : > { %1166 = vrot.lane.b32.xlu1 %v4619_v26, %s2659_s14  ;;  %v1496_v60 = vsel %vm1487_vm8, %v1463_v13, %v1051_v11  ;;  %v4625_v13 = vld [vmem:[#allocation27_spill] sm:$0xff] }
 0x18c   : > { %1072 = vrot.lane.b32.xlu0 %v2504_v58, %s2658_s8 }
 0x18d   : > { %v863_v17 = vpop.permute.xlu1 %862 }
 0x18e   : > { %v1147_v50 = vpop.permute.xlu0 %1146  ;;  %v1432_v27 = vsel %vm1421_vm6, %v1399_v57, %v863_v17 }
 0x18f   : > { %882 = vrot.lane.b32.xlu1 %v4619_v26, %s2656_s11  ;;  %v1529_v63 = vsel %vm1520_vm9, %v1496_v60, %v1147_v50 }
 0x190   : > { %788 = vrot.lane.b32.xlu0 %v2504_v58, %s2655_s10  ;;  %v1400_v58 = vsel %vm1388_vm5, %v3494_v14, %v3701_v59 }
 0x191   : > { %v1243_v34 = vpop.permute.xlu1 %1242 }
 0x192   : > { %v1562_v52 = vsel %vm1553_vm10, %v1529_v63, %v1243_v34  ;;  %v1149_v56 = vpop.permute.xlu0 %1148 }
 0x193   : > { %1262 = vrot.lane.b32.xlu1 %v4620_v43, %s2660_s24  ;;  %2370 = vmatprep.mubr.msk.f32.mxu0 %vm1591_vm11, %v1562_v52  ;;  %v1530_v28 = vsel %vm1520_vm9, %v1497_v5, %v1149_v56 }
 0x194   : > { %1168 = vrot.lane.b32.xlu0 %v4621_v53, %s2659_s14 }
 0x195   : > { %v959_v18 = vpop.permute.xlu1 %958 }
 0x196   : > { %v865_v62 = vpop.permute.xlu0 %864  ;;  %v1465_v39 = vsel %vm1454_vm7, %v1432_v27, %v959_v18  ;;  %v4628_v27 = vld [vmem:[#allocation52_spill] sm:$0xff] }
 0x197   : > { %978 = vrot.lane.b32.xlu1 %v4620_v43, %s2657_s26  ;;  %v1433_v17 = vsel %vm1421_vm6, %v1400_v58, %v865_v62  ;;  %v4626_v43 = vld [vmem:[#allocation48_spill] sm:$0xff]  ;;  %v1401_v62 = vsel %vm1388_vm5, %v3513_v33, %v3711_v40  ;;  %v2509_v58 = vld [vmem:[%s2754_s7 + $0x150] sm:$0xff] }
 0x198   : > { %884 = vrot.lane.b32.xlu0 %v4621_v53, %s2656_s11 }
 0x199   : > { %v961_v37 = vpop.permute.xlu1 %960 }
 0x19a   : > { %v1245_v19 = vpop.permute.xlu0 %1244  ;;  %v1466_v50 = vsel %vm1454_vm7, %v1433_v17, %v961_v37 }
 0x19b   : > { %v1563_v49 = vsel %vm1553_vm10, %v1530_v28, %v1245_v19  ;;  %980 = vrot.lane.b32.xlu1 %v4622_v7, %s2657_s26  ;;  %v4627_v28 = vld [vmem:[#allocation30_spill] sm:$0xff] }
 0x19c   : > { %1264 = vrot.lane.b32.xlu0 %v4622_v7, %s2660_s24  ;;  %2371 = vmatmul.mubr.msk.f32.gmra.mrb[8].mxu0 %vm1591_vm11, %v1563_v49  ;;  %v2508_v49 = vld [vmem:[%s2754_s7 + $0x140] sm:$0xff] }
 0x19d   : > { %v1057_v54 = vpop.permute.xlu1 %1056 }
 0x19e   : > { %v1055_v44 = vpop.permute.xlu0 %1054  ;;  %v1499_v60 = vsel %vm1487_vm8, %v1466_v50, %v1057_v54 }
 0x19f   : > { %790 = vrot.lane.b32.xlu1 %v2505_v46, %s2655_s10  ;;  %v1498_v48 = vsel %vm1487_vm8, %v1465_v39, %v1055_v44  ;;  %v4629_v39 = vld [vmem:[#allocation29_spill] sm:$0xff] }
 0x1a0   : > { %1074 = vrot.lane.b32.xlu0 %v2505_v46, %s2658_s8  ;;  %v1402_v46 = vsel %vm1388_vm5, %v3510_v20, %v3709_v38 }
 0x1a1   : > { %v867_v3 = vpop.permute.xlu1 %866 }
 0x1a2   : > { %v1151_v4 = vpop.permute.xlu0 %1150  ;;  %v1434_v9 = vsel %vm1421_vm6, %v1401_v62, %v867_v3 }
 0x1a3   : > { %1170 = vrot.lane.b32.xlu1 %v4623_v31, %s2659_s14  ;;  %v1531_v8 = vsel %vm1520_vm9, %v1498_v48, %v1151_v4 }
 0x1a4   : > { %1076 = vrot.lane.b32.xlu0 %v2506_v41, %s2658_s8 }
 0x1a5   : > { %v1247_v11 = vpop.permute.xlu1 %1246 }
 0x1a6   : > { %v1564_v26 = vsel %vm1553_vm10, %v1531_v8, %v1247_v11  ;;  %v1153_v22 = vpop.permute.xlu0 %1152 }
 0x1a7   : > { %886 = vrot.lane.b32.xlu1 %v4623_v31, %s2656_s11  ;;  %2373 = vmatprep.mubr.msk.f32.mxu0 %vm1591_vm11, %v1564_v26  ;;  %v1532_v34 = vsel %vm1520_vm9, %v1499_v60, %v1153_v22  ;;  %v4630_v26 = vld [vmem:[#allocation50_spill] sm:$0xff]  ;;  %v4631_v60 = vld [vmem:[#allocation32_spill] sm:$0xff] }
 0x1a8   : > { %792 = vrot.lane.b32.xlu0 %v2506_v41, %s2655_s10 }
 0x1a9   : > { %v963_v2 = vpop.permute.xlu1 %962 }
 0x1aa   : > { %v869_v16 = vpop.permute.xlu0 %868  ;;  %v1467_v37 = vsel %vm1454_vm7, %v1434_v9, %v963_v2 }
 0x1ab   : > { %1266 = vrot.lane.b32.xlu1 %v4624_v12, %s2660_s24  ;;  %v1435_v3 = vsel %vm1421_vm6, %v1402_v46, %v869_v16 }
 0x1ac   : > { %1172 = vrot.lane.b32.xlu0 %v4625_v13, %s2659_s14 }
 0x1ad   : > { %v965_v63 = vpop.permute.xlu1 %964 }
 0x1ae   : > { %v1249_v52 = vpop.permute.xlu0 %1248  ;;  %v1468_v4 = vsel %vm1454_vm7, %v1435_v3, %v965_v63 }
 0x1af   : > { %v1565_v14 = vsel %vm1553_vm10, %v1532_v34, %v1249_v52  ;;  %982 = vrot.lane.b32.xlu1 %v4624_v12, %s2657_s26  ;;  %v2510_v34 = vld [vmem:[%s2754_s7 + $0x158] sm:$0xff] }
 0x1b0   : > { %888 = vrot.lane.b32.xlu0 %v4625_v13, %s2656_s11  ;;  %2374 = vmatmul.mubr.msk.f32.gmra.mrb[10].mxu0 %vm1591_vm11, %v1565_v14 }
 0x1b1   : > { %v775_v59 = vpop.permute.xlu1 %774 }
 0x1b2   : > { %v1059_v56 = vpop.permute.xlu0 %1058  ;;  %v1403_v16 = vsel %vm1388_vm5, %v3529_v36, %v775_v59 }
 0x1b3   : > { %984 = vrot.lane.b32.xlu1 %v4626_v43, %s2657_s26  ;;  %v1500_v19 = vsel %vm1487_vm8, %v1467_v37, %v1059_v56 }
 0x1b4   : > { %1268 = vrot.lane.b32.xlu0 %v4626_v43, %s2660_s24 }
 0x1b5   : > { %v1155_v53 = vpop.permute.xlu1 %1154 }
 0x1b6   : > { %v1061_v18 = vpop.permute.xlu0 %1060  ;;  %v1533_v7 = vsel %vm1520_vm9, %v1500_v19, %v1155_v53 }
 0x1b7   : > { %794 = vrot.lane.b32.xlu1 %v2507_v42, %s2655_s10  ;;  %v1501_v31 = vsel %vm1487_vm8, %v1468_v4, %v1061_v18  ;;  %v4635_v4 = vld [vmem:[#allocation34_spill] sm:$0xff] }
 0x1b8   : > { %1078 = vrot.lane.b32.xlu0 %v2507_v42, %s2658_s8  ;;  %v4632_v42 = vld [vmem:[#allocation56_spill] sm:$0xff] }
 0x1b9   : > { %v871_v24 = vpop.permute.xlu1 %870 }
 0x1ba   : > { %v777_v5 = vpop.permute.xlu0 %776  ;;  %v1436_v12 = vsel %vm1421_vm6, %v1403_v16, %v871_v24  ;;  %v4633_v24 = vld [vmem:[#allocation31_spill] sm:$0xff] }
 0x1bb   : > { %1174 = vrot.lane.b32.xlu1 %v4627_v28, %s2659_s14  ;;  %v1404_v43 = vsel %vm1388_vm5, %v3526_v21, %v777_v5 }
 0x1bc   : > { %1080 = vrot.lane.b32.xlu0 %v2508_v49, %s2658_s8 }
 0x1bd   : > { %v1251_v54 = vpop.permute.xlu1 %1250 }
 0x1be   : > { %v1566_v44 = vsel %vm1553_vm10, %v1533_v7, %v1251_v54  ;;  %v1157_v33 = vpop.permute.xlu0 %1156  ;;  %v4634_v7 = vld [vmem:[#allocation54_spill] sm:$0xff] }
 0x1bf   : > { %890 = vrot.lane.b32.xlu1 %v4627_v28, %s2656_s11  ;;  %2376 = vmatprep.mubr.msk.f32.mxu0 %vm1591_vm11, %v1566_v44  ;;  %v1534_v41 = vsel %vm1520_vm9, %v1501_v31, %v1157_v33  ;;  %v2511_v33 = vld [vmem:[%s2754_s7 + $0x168] sm:$0xff]  ;;  %v2512_v31 = vld [vmem:[%s2754_s7 + $0x170] sm:$0xff] }
 0x1c0   : > { %796 = vrot.lane.b32.xlu0 %v2508_v49, %s2655_s10 }
 0x1c1   : > { %v967_v40 = vpop.permute.xlu1 %966 }
 0x1c2   : > { %v873_v57 = vpop.permute.xlu0 %872  ;;  %v1469_v13 = vsel %vm1454_vm7, %v1436_v12, %v967_v40 }
 0x1c3   : > { %1270 = vrot.lane.b32.xlu1 %v4628_v27, %s2660_s24  ;;  %v1437_v18 = vsel %vm1421_vm6, %v1404_v43, %v873_v57 }
 0x1c4   : > { %1176 = vrot.lane.b32.xlu0 %v4629_v39, %s2659_s14 }
 0x1c5   : > { %v969_v48 = vpop.permute.xlu1 %968 }
 0x1c6   : > { %v1253_v8 = vpop.permute.xlu0 %1252  ;;  %v1470_v62 = vsel %vm1454_vm7, %v1437_v18, %v969_v48 }
 0x1c7   : > { %v1567_v20 = vsel %vm1553_vm10, %v1534_v41, %v1253_v8  ;;  %986 = vrot.lane.b32.xlu1 %v4628_v27, %s2657_s26 }
 0x1c8   : > { %892 = vrot.lane.b32.xlu0 %v4629_v39, %s2656_s11  ;;  %2377 = vmatmul.mubr.msk.f32.gmra.mrb[12].mxu0 %vm1591_vm11, %v1567_v20 }
 0x1c9   : > { %v779_v38 = vpop.permute.xlu1 %778 }
 0x1ca   : > { %v1063_v11 = vpop.permute.xlu0 %1062  ;;  %v1405_v40 = vsel %vm1388_vm5, %v3545_v6, %v779_v38 }
 0x1cb   : > { %988 = vrot.lane.b32.xlu1 %v4630_v26, %s2657_s26  ;;  %v1502_v63 = vsel %vm1487_vm8, %v1469_v13, %v1063_v11 }
 0x1cc   : > { %1272 = vrot.lane.b32.xlu0 %v4630_v26, %s2660_s24 }
 0x1cd   : > { %v1159_v22 = vpop.permute.xlu1 %1158 }
 0x1ce   : > { %v1065_v2 = vpop.permute.xlu0 %1064  ;;  %v1535_v52 = vsel %vm1520_vm9, %v1502_v63, %v1159_v22  ;;  %v4636_v22 = vld [vmem:[#allocation60_spill] sm:$0xff]  ;;  %v313_v63 = vld [vmem:[%s2754_s7 + $0x188] sm:$0xff] }
 0x1cf   : > { %798 = vrot.lane.b32.xlu1 %v2509_v58, %s2655_s10  ;;  %v1503_v9 = vsel %vm1487_vm8, %v1470_v62, %v1065_v2 }
 0x1d0   : > { %1082 = vrot.lane.b32.xlu0 %v2509_v58, %s2658_s8  ;;  %v4637_v58 = vld [vmem:[#allocation33_spill] sm:$0xff] }
 0x1d1   : > { %v875_v17 = vpop.permute.xlu1 %874 }
 0x1d2   : > { %v781_v50 = vpop.permute.xlu0 %780  ;;  %v1438_v57 = vsel %vm1421_vm6, %v1405_v40, %v875_v17 }
 0x1d3   : > { %1178 = vrot.lane.b32.xlu1 %v4631_v60, %s2659_s14  ;;  %v1406_v38 = vsel %vm1388_vm5, %v3542_v23, %v781_v50 }
 0x1d4   : > { %1084 = vrot.lane.b32.xlu0 %v2510_v34, %s2658_s8 }
 0x1d5   : > { %v1255_v14 = vpop.permute.xlu1 %1254 }
 0x1d6   : > { %v1568_v56 = vsel %vm1553_vm10, %v1535_v52, %v1255_v14  ;;  %v1161_v36 = vpop.permute.xlu0 %1160  ;;  %v4638_v52 = vld [vmem:[#allocation58_spill] sm:$0xff] }
 0x1d7   : > { %894 = vrot.lane.b32.xlu1 %v4631_v60, %s2656_s11  ;;  %2379 = vmatprep.mubr.msk.f32.mxu0 %vm1591_vm11, %v1568_v56  ;;  %v1536_v28 = vsel %vm1520_vm9, %v1503_v9, %v1161_v36  ;;  %v312_v60 = vld [vmem:[%s2754_s7 + $0x180] sm:$0xff]  ;;  %v532_v56 = vrot.slane %v313_v63, 1 }
 0x1d8   : > { %800 = vrot.lane.b32.xlu0 %v2510_v34, %s2655_s10  ;;  %v531_v14 = vrot.slane %v312_v60, 1 }
 0x1d9   : > { %v971_v59 = vpop.permute.xlu1 %970 }
 0x1da   : > { %v877_v53 = vpop.permute.xlu0 %876  ;;  %v1471_v27 = vsel %vm1454_vm7, %v1438_v57, %v971_v59  ;;  %v533_v43 = vsel %vm366_vm0, %v531_v14, %v532_v56 }
 0x1db   : > { %1274 = vrot.lane.b32.xlu1 %v4632_v42, %s2660_s24  ;;  %v1439_v26 = vsel %vm1421_vm6, %v1406_v38, %v877_v53 }
 0x1dc   : > { %1180 = vrot.lane.b32.xlu0 %v4633_v24, %s2659_s14 }
 0x1dd   : > { %v973_v37 = vpop.permute.xlu1 %972 }
 0x1de   : > { %v1257_v19 = vpop.permute.xlu0 %1256  ;;  %v1472_v2 = vsel %vm1454_vm7, %v1439_v26, %v973_v37 }
 0x1df   : > { %v1569_v21 = vsel %vm1553_vm10, %v1536_v28, %v1257_v19  ;;  %990 = vrot.lane.b32.xlu1 %v4632_v42, %s2657_s26  ;;  %v536_v28 = vrot.slane %v312_v60, 2  ;;  %v537_v19 = vrot.slane %v313_v63, 2 }
 0x1e0   : > { %896 = vrot.lane.b32.xlu0 %v4633_v24, %s2656_s11  ;;  %2380 = vmatmul.mubr.msk.f32.gmra.mrb[14].mxu0 %vm1591_vm11, %v1569_v21  ;;  %v314_v24 = vld [vmem:[%s2754_s7 + $0x190] sm:$0x3] }
 0x1e1   : > { %v783_v5 = vpop.permute.xlu1 %782 }
 0x1e2   : > { %v1067_v49 = vpop.permute.xlu0 %1066  ;;  %v1407_v53 = vsel %vm1388_vm5, %v3561_v45, %v783_v5  ;;  %v534_v45 = vrot.slane %v314_v24, 1 }
 0x1e3   : > { %992 = vrot.lane.b32.xlu1 %v4634_v7, %s2657_s26  ;;  %v1504_v39 = vsel %vm1487_vm8, %v1471_v27, %v1067_v49 }
 0x1e4   : > { %1276 = vrot.lane.b32.xlu0 %v4634_v7, %s2660_s24 }
 0x1e5   : > { %v1163_v54 = vpop.permute.xlu1 %1162 }
 0x1e6   : > { %v1069_v44 = vpop.permute.xlu0 %1068  ;;  %v1537_v48 = vsel %vm1520_vm9, %v1504_v39, %v1163_v54  ;;  %v538_v54 = vsel %vm447_vm1, %v536_v28, %v537_v19 }
 0x1e7   : > { %802 = vrot.lane.b32.xlu1 %v2511_v33, %s2655_s10  ;;  %v1505_v16 = vsel %vm1487_vm8, %v1472_v2, %v1069_v44 }
 0x1e8   : > { %1086 = vrot.lane.b32.xlu0 %v2511_v33, %s2658_s8  ;;  %v535_v33 = vsel %vm366_vm0, %v532_v56, %v534_v45 }
 0x1e9   : > { %v879_v46 = vpop.permute.xlu1 %878 }
 0x1ea   : > { %v4062_v3 = vpop.permute.xlu0 %784  ;;  %v1440_v42 = vsel %vm1421_vm6, %v1407_v53, %v879_v46 }
 0x1eb   : > { %1182 = vrot.lane.b32.xlu1 %v4635_v4, %s2659_s14  ;;  %v1408_v40 = vsel %vm1388_vm5, %v3558_v0, %v4062_v3 }
 0x1ec   : > { %1088 = vrot.lane.b32.xlu0 %v2512_v31, %s2658_s8 }
 0x1ed   : > { %v1259_v41 = vpop.permute.xlu1 %1258 }
 0x1ee   : > { %v1165_v8 = vpop.permute.xlu0 %1164  ;;  %v1570_v6 = vsel %vm1553_vm10, %v1537_v48, %v1259_v41 }
 0x1ef   : > { %898 = vrot.lane.b32.xlu1 %v4635_v4, %s2656_s11  ;;  %2382 = vmatprep.mubr.msk.f32.mxu1 %vm1591_vm11, %v1570_v6  ;;  %v1538_v12 = vsel %vm1520_vm9, %v1505_v16, %v1165_v8  ;;  %v539_v4 = vrot.slane %v314_v24, 2  ;;  %v316_v6 = vld [vmem:[%s2754_s7 + $0x1a0] sm:$0xff] }
 0x1f0   : > { %804 = vrot.lane.b32.xlu0 %v2512_v31, %s2655_s10  ;;  %v545_v26 = vrot.slane %v316_v6, 1 }
 0x1f1   : > { %v975_v20 = vpop.permute.xlu1 %974  ;;  %v540_v41 = vsel %vm447_vm1, %v537_v19, %v539_v4 }
 0x1f2   : > { %v881_v11 = vpop.permute.xlu0 %880  ;;  %v1473_v9 = vsel %vm1454_vm7, %v1440_v42, %v975_v20  ;;  %v317_v20 = vld [vmem:[%s2754_s7 + $0x1a8] sm:$0x3] }
 0x1f3   : > { %1278 = vrot.lane.b32.xlu1 %v4636_v22, %s2660_s24  ;;  %v1441_v57 = vsel %vm1421_vm6, %v1408_v40, %v881_v11  ;;  %v315_v11 = vld [vmem:[%s2754_s7 + $0x198] sm:$0xff] }
 0x1f4   : > { %1184 = vrot.lane.b32.xlu0 %v4637_v58, %s2659_s14 }
 0x1f5   : > { %v977_v17 = vpop.permute.xlu1 %976 }
 0x1f6   : > { %v1261_v13 = vpop.permute.xlu0 %1260  ;;  %v1474_v27 = vsel %vm1454_vm7, %v1441_v57, %v977_v17  ;;  %v550_v17 = vrot.slane %v316_v6, 2 }
 0x1f7   : > { %v1571_v23 = vsel %vm1553_vm10, %v1538_v12, %v1261_v13  ;;  %994 = vrot.lane.b32.xlu1 %v4636_v22, %s2657_s26  ;;  %v547_v22 = vrot.slane %v317_v20, 1  ;;  %v552_v13 = vrot.slane %v317_v20, 2 }
 0x1f8   : > { %900 = vrot.lane.b32.xlu0 %v4637_v58, %s2656_s11  ;;  %2383 = vmatmul.mubr.msk.f32.vlgmr.msra.gmra.mrb[0].mxu1 %vm1591_vm11, %v1571_v23  ;;  %v544_v58 = vrot.slane %v315_v11, 1 }
 0x1f9   : > { %v4092_v50 = vpop.permute.xlu1 %786  ;;  %v548_v12 = vsel %vm366_vm0, %v545_v26, %v547_v22 }
 0x1fa   : > { %v1071_v34 = vpop.permute.xlu0 %1070  ;;  %v1409_v23 = vsel %vm1388_vm5, %v3577_v10, %v4092_v50 }
 0x1fb   : > { %996 = vrot.lane.b32.xlu1 %v4638_v52, %s2657_s26  ;;  %v1506_v37 = vsel %vm1487_vm8, %v1473_v9, %v1071_v34  ;;  %v546_v34 = vsel %vm366_vm0, %v544_v58, %v545_v26 }
 0x1fc   : > { %1280 = vrot.lane.b32.xlu0 %v4638_v52, %s2660_s24 }
 0x1fd   : > { %v1167_v36 = vpop.permute.xlu1 %1166 }
 0x1fe   : > { %v1073_v59 = vpop.permute.xlu0 %1072  ;;  %v1539_v21 = vsel %vm1520_vm9, %v1506_v37, %v1167_v36 }
 0x1ff   : > { %806 = vrot.lane.b32.xlu1 %v312_v60, %s2655_s10  ;;  %v1507_v39 = vsel %vm1487_vm8, %v1474_v27, %v1073_v59  ;;  %v553_v59 = vsel %vm447_vm1, %v550_v17, %v552_v13 }
 0x200   : > { %1090 = vrot.lane.b32.xlu0 %v312_v60, %s2658_s8  ;;  %v549_v60 = vrot.slane %v315_v11, 2 }
 0x201   : > { %v883_v18 = vpop.permute.xlu1 %882 }
 0x202   : > { %v4106_v62 = vpop.permute.xlu0 %788  ;;  %v1442_v52 = vsel %vm1421_vm6, %v1409_v23, %v883_v18 }
 0x203   : > { %1186 = vrot.lane.b32.xlu1 %v533_v43, %s2659_s14 }
 0x204   : > { %1092 = vrot.lane.b32.xlu0 %v313_v63, %s2658_s8 }
 0x205   : > { %v1263_v49 = vpop.permute.xlu1 %1262 }
 0x206   : > { %v1572_v5 = vsel %vm1553_vm10, %v1539_v21, %v1263_v49  ;;  %v1169_v7 = vpop.permute.xlu0 %1168  ;;  %v1410_v21 = vsel %vm1388_vm5, %v3574_v32, %v4106_v62 }
 0x207   : > { %902 = vrot.lane.b32.xlu1 %v533_v43, %s2656_s11  ;;  %2385 = vmatprep.mubr.msk.f32.mxu1 %vm1591_vm11, %v1572_v5  ;;  %v1540_v48 = vsel %vm1520_vm9, %v1507_v39, %v1169_v7  ;;  %v551_v43 = vsel %vm447_vm1, %v549_v60, %v550_v17 }
 0x208   : > { %808 = vrot.lane.b32.xlu0 %v313_v63, %s2655_s10  ;;  %s4145_s10 = sand.u32 1, %s2635_s16  }
 0x209   : > { %v979_v44 = vpop.permute.xlu1 %978  ;;  %s2266_s7 = sshll.u32 %s4145_s10, 8 }
 0x20a   : > { %v4123_v46 = vpop.permute.xlu0 %884  ;;  %v1475_v56 = vsel %vm1454_vm7, %v1442_v52, %v979_v44 }
 0x20b   : > { %1282 = vrot.lane.b32.xlu1 %v538_v54, %s2660_s24  ;;  %v1443_v45 = vsel %vm1421_vm6, %v1410_v21, %v4123_v46 }
 0x20c   : > { %1188 = vrot.lane.b32.xlu0 %v535_v33, %s2659_s14 }
 0x20d   : > { %v981_v31 = vpop.permute.xlu1 %980 }
 0x20e   : > { %v1265_v0 = vpop.permute.xlu0 %1264  ;;  %v1476_v7 = vsel %vm1454_vm7, %v1443_v45, %v981_v31 }
 0x20f   : > { %v1573_v3 = vsel %vm1553_vm10, %v1540_v48, %v1265_v0  ;;  %998 = vrot.lane.b32.xlu1 %v538_v54, %s2657_s26 }
 0x210   : > { %904 = vrot.lane.b32.xlu0 %v535_v33, %s2656_s11  ;;  %2386 = vmatmul.mubr.msk.f32.gmra.mrb[2].mxu1 %vm1591_vm11, %v1573_v3  ;;  %s4165_s11 = scalar_lea.vmem [#allocation2], %s2266_s7 }
 0x211   : > { %v4136_v8 = vpop.permute.xlu1 %790  ;;  %s2082_s29 = sshll.u32 %s4165_s11, 4  ;;  %s4296_s29 = int_to_ptr.vmem [resolvable:$true] %s2082_s29 }
 0x212   : > { %v1075_v38 = vpop.permute.xlu0 %1074  ;;  %v1411_v46 = vsel %vm1388_vm5, %v3593_v51, %v4136_v8  ;;  %s2513_s12 = scalar_lea.vmem %s4296_s29, 4096 }
 0x213   : > { %1000 = vrot.lane.b32.xlu1 %v540_v41, %s2657_s26  ;;  %v1508_v36 = vsel %vm1487_vm8, %v1475_v56, %v1075_v38  ;;  %s2310_s26 = sshll.u32 %s2643_s18, 12  ;;  %p2514_p12 = scmp.ne.s32.totalorder %s4296_s29, %s2513_s12 }
 0x214   : > { %1284 = vrot.lane.b32.xlu0 %v540_v41, %s2660_s24  ;;  %s4294_s6 = scalar_lea.hbm %s4423_s2, %s2310_s26 }
 0x215   : > { %v1171_v2 = vpop.permute.xlu1 %1170  ;;  %p2515_p13 = pnand %p2514_p12, %p2732_p4 }
 0x216   : > { %v1077_v16 = vpop.permute.xlu0 %1076  ;;  %v1541_v10 = vsel %vm1520_vm9, %v1508_v36, %v1171_v2 }
 0x217   : > { %1096 = vrot.lane.b32.xlu1 %v316_v6, %s2658_s8  ;;  %v1509_v54 = vsel %vm1487_vm8, %v1476_v7, %v1077_v16  ;;  %p2516_p0 = pneg %p2515_p13 }
 0x218   : > { %1094 = vrot.lane.b32.xlu0 %v315_v11, %s2658_s8  ;;  %s2058_s8 = scalar_lea.sflag [#allocation3], %s4145_s10 }
 0x219   : > { %v887_v63 = vpop.permute.xlu1 %886 }
 0x21a   : > { %v793_v14 = vpop.permute.xlu0 %792  ;;  %v1444_v31 = vsel %vm1421_vm6, %v1411_v46, %v887_v63 }
 0x21b   : > { %1192 = vrot.lane.b32.xlu1 %v548_v12, %s2659_s14  ;;  %v1412_v12 = vsel %vm1388_vm5, %v3590_v29, %v793_v14 }
 0x21c   : > { %1190 = vrot.lane.b32.xlu0 %v546_v34, %s2659_s14  ;;  %s2517_s14 = sshll.u32 %s2661_s13, 4  ;;  %s2518_s14 = int_to_ptr.vmem [resolvable:$false] %s2517_s14 }
 0x21d   : > { %v1267_v50 = vpop.permute.xlu1 %1266  ;;  %p2520_p1 = scmp.lt.s32.totalorder %s4296_s29, %s2518_s14 }
 0x21e   : > { %v1574_v53 = vsel %vm1553_vm10, %v1541_v10, %v1267_v50  ;;  %v1173_v18 = vpop.permute.xlu0 %1172 }
 0x21f   : > { %v2360_v42 = vpop.f32.mrb[0].mxu0  ;;  %1288 = vrot.lane.b32.xlu1 %v553_v59, %s2660_s24  ;;  %2388 = vmatprep.mubr.msk.f32.mxu1 %vm1591_vm11, %v1574_v53  ;;  %v1542_v33 = vsel %vm1520_vm9, %v1509_v54, %v1173_v18 }
 0x220   : > { %1918 = vst [vmem:[%s4165_s11 + $0x8] sm:$0xff] %v2360_v42  ;;  %v1988_v24 = vmul.f32 %v2360_v42, %v2360_v42  ;;  %v1758_v9 = vpop.f32.mrb[1].mxu0  ;;  %1286 = vrot.lane.b32.xlu0 %v551_v43, %s2660_s24  ;;  %s2519_s24 = scalar_lea.vmem %s2518_s14, 8192 }
 0x221   : > { %1917 = vst [vmem:[%s4165_s11] sm:$0xff] %v1758_v9  ;;  %v1949_v37 = vadd.f32 %v2360_v42, %v1758_v9  ;;  %v1987_v28 = vmul.f32 %v1758_v9, %v1758_v9  ;;  %v983_v19 = vpop.permute.xlu1 %982  ;;  %p2521_p2 = scmp.lt.s32.totalorder %s2519_s24, %s2513_s12 }
 0x222   : > { %v889_v49 = vpop.permute.xlu0 %888  ;;  %v1477_v0 = vsel %vm1454_vm7, %v1444_v31, %v983_v19 }
 0x223   : > { %v2019_v5 = vadd.f32 %v1988_v24, %v1987_v28  ;;  %v1445_v23 = vsel %vm1421_vm6, %v1412_v12, %v889_v49  ;;  %p2522_p3 = por %p2521_p2, %p2520_p1 }
 0x225   : > { %v985_v44 = vpop.permute.xlu1 %984  ;;  %p2523_p5 = pnand %p2522_p3, %p2516_p0 }
 0x226   : > { %v1269_v40 = vpop.permute.xlu0 %1268  ;;  %v1478_v60 = vsel %vm1454_vm7, %v1445_v23, %v985_v44 }
 0x227   : > { %v1575_v57 = vsel %vm1553_vm10, %v1542_v33, %v1269_v40 }
 0x228   : > { %2389 = vmatmul.mubr.msk.f32.gmra.mrb[4].mxu1 %vm1591_vm11, %v1575_v57 }
 0x229   : > { %v795_v32 = vpop.permute.xlu1 %794 }
 0x22a   : > { %v1079_v62 = vpop.permute.xlu0 %1078  ;;  %v1413_v53 = vsel %vm1388_vm5, %v3609_v25, %v795_v32 }
 0x22b   : > { %v1510_v41 = vsel %vm1487_vm8, %v1477_v0, %v1079_v62 }
 0x22d   : > { %v1175_v27 = vpop.permute.xlu1 %1174 }
 0x22e   : > { %v1081_v4 = vpop.permute.xlu0 %1080  ;;  %v1543_v20 = vsel %vm1520_vm9, %v1510_v41, %v1175_v27 }
 0x22f   : > { %v1511_v63 = vsel %vm1487_vm8, %v1478_v60, %v1081_v4 }
 0x231   : > { %v891_v39 = vpop.permute.xlu1 %890 }
 0x232   : > { %v797_v48 = vpop.permute.xlu0 %796  ;;  %v1446_v9 = vsel %vm1421_vm6, %v1413_v53, %v891_v39 }
 0x233   : > { %v2363_v3 = vpop.f32.mrb[2].mxu0  ;;  %v1414_v40 = vsel %vm1388_vm5, %v3606_v55, %v797_v48 }
 0x234   : > { %1920 = vst [vmem:[%s4165_s11 + $0x18] sm:$0xff] %v2363_v3  ;;  %v1768_v6 = vpop.f32.mrb[3].mxu0  ;;  %v1990_v8 = vmul.f32 %v2363_v3, %v2363_v3 }
 0x235   : > { %1919 = vst [vmem:[%s4165_s11 + $0x10] sm:$0xff] %v1768_v6  ;;  %v1950_v38 = vadd.f32 %v1949_v37, %v1768_v6  ;;  %v1989_v11 = vmul.f32 %v1768_v6, %v1768_v6  ;;  %v1271_v26 = vpop.permute.xlu1 %1270 }
 0x236   : > { %v1576_v22 = vsel %vm1553_vm10, %v1543_v20, %v1271_v26  ;;  %v1177_v51 = vpop.permute.xlu0 %1176 }
 0x237   : > { %v2020_v2 = vadd.f32 %v2019_v5, %v1989_v11  ;;  %2391 = vmatprep.mubr.msk.f32.mxu1 %vm1591_vm11, %v1576_v22  ;;  %v1951_v58 = vadd.f32 %v2363_v3, %v1950_v38  ;;  %v1544_v52 = vsel %vm1520_vm9, %v1511_v63, %v1177_v51 }
 0x239   : > { %v987_v16 = vpop.permute.xlu1 %986  ;;  %v2021_v17 = vadd.f32 %v2020_v2, %v1990_v8 }
 0x23a   : > { %v893_v13 = vpop.permute.xlu0 %892  ;;  %v1479_v28 = vsel %vm1454_vm7, %v1446_v9, %v987_v16 }
 0x23b   : > { %v1447_v32 = vsel %vm1421_vm6, %v1414_v40, %v893_v13 }
 0x23d   : > { %v989_v34 = vpop.permute.xlu1 %988 }
 0x23e   : > { %v1273_v56 = vpop.permute.xlu0 %1272  ;;  %v1480_v62 = vsel %vm1454_vm7, %v1447_v32, %v989_v34 }
 0x23f   : > { %v1577_v36 = vsel %vm1553_vm10, %v1544_v52, %v1273_v56 }
 0x240   : > { %2392 = vmatmul.mubr.msk.f32.gmra.mrb[6].mxu1 %vm1591_vm11, %v1577_v36 }
 0x241   : > { %v799_v59 = vpop.permute.xlu1 %798 }
 0x242   : > { %v1083_v10 = vpop.permute.xlu0 %1082  ;;  %v1415_v51 = vsel %vm1388_vm5, %v3625_v61, %v799_v59 }
 0x243   : > { %v1512_v45 = vsel %vm1487_vm8, %v1479_v28, %v1083_v10 }
 0x245   : > { %v1179_v50 = vpop.permute.xlu1 %1178 }
 0x246   : > { %v1085_v29 = vpop.permute.xlu0 %1084  ;;  %v1545_v5 = vsel %vm1520_vm9, %v1512_v45, %v1179_v50 }
 0x247   : > { %v2366_v14 = vpop.f32.mrb[4].mxu0  ;;  %v1513_v27 = vsel %vm1487_vm8, %v1480_v62, %v1085_v29 }
 0x248   : > { %1922 = vst [vmem:[%s4165_s11 + $0x28] sm:$0xff] %v2366_v14  ;;  %v1778_v43 = vpop.f32.mrb[5].mxu0  ;;  %v1992_v19 = vmul.f32 %v2366_v14, %v2366_v14 }
 0x249   : > { %1921 = vst [vmem:[%s4165_s11 + $0x20] sm:$0xff] %v1778_v43  ;;  %v1952_v18 = vadd.f32 %v1951_v58, %v1778_v43  ;;  %v1991_v42 = vmul.f32 %v1778_v43, %v1778_v43  ;;  %v895_v24 = vpop.permute.xlu1 %894 }
 0x24a   : > { %v801_v37 = vpop.permute.xlu0 %800  ;;  %v1448_v58 = vsel %vm1421_vm6, %v1415_v51, %v895_v24 }
 0x24b   : > { %v2022_v21 = vadd.f32 %v2021_v17, %v1991_v42  ;;  %v1953_v49 = vadd.f32 %v2366_v14, %v1952_v18  ;;  %v1416_v34 = vsel %vm1388_vm5, %v3622_v47, %v801_v37 }
 0x24d   : > { %v1275_v7 = vpop.permute.xlu1 %1274  ;;  %v2023_v54 = vadd.f32 %v2022_v21, %v1992_v19 }
 0x24e   : > { %v1578_v25 = vsel %vm1553_vm10, %v1545_v5, %v1275_v7  ;;  %v1181_v44 = vpop.permute.xlu0 %1180 }
 0x24f   : > { %2394 = vmatprep.mubr.msk.f32.mxu1 %vm1591_vm11, %v1578_v25  ;;  %v1546_v46 = vsel %vm1520_vm9, %v1513_v27, %v1181_v44 }
 0x251   : > { %v991_v33 = vpop.permute.xlu1 %990 }
 0x252   : > { %v897_v57 = vpop.permute.xlu0 %896  ;;  %v1481_v17 = vsel %vm1454_vm7, %v1448_v58, %v991_v33 }
 0x253   : > { %v1449_v56 = vsel %vm1421_vm6, %v1416_v34, %v897_v57 }
 0x255   : > { %v993_v4 = vpop.permute.xlu1 %992 }
 0x256   : > { %v1277_v39 = vpop.permute.xlu0 %1276  ;;  %v1482_v36 = vsel %vm1454_vm7, %v1449_v56, %v993_v4 }
 0x257   : > { %v1579_v31 = vsel %vm1553_vm10, %v1546_v46, %v1277_v39 }
 0x258   : > { %2395 = vmatmul.mubr.msk.f32.gmra.mrb[8].mxu1 %vm1591_vm11, %v1579_v31 }
 0x259   : > { %v803_v0 = vpop.permute.xlu1 %802 }
 0x25a   : > { %v1087_v3 = vpop.permute.xlu0 %1086  ;;  %v1417_v45 = vsel %vm1388_vm5, %v3641_v1, %v803_v0 }
 0x25b   : > { %v2369_v41 = vpop.f32.mrb[6].mxu0  ;;  %v1514_v12 = vsel %vm1487_vm8, %v1481_v17, %v1087_v3 }
 0x25c   : > { %1924 = vst [vmem:[%s4165_s11 + $0x38] sm:$0xff] %v2369_v41  ;;  %v1788_v55 = vpop.f32.mrb[7].mxu0  ;;  %v1994_v11 = vmul.f32 %v2369_v41, %v2369_v41 }
 0x25d   : > { %1923 = vst [vmem:[%s4165_s11 + $0x30] sm:$0xff] %v1788_v55  ;;  %v1954_v48 = vadd.f32 %v1953_v49, %v1788_v55  ;;  %v1993_v6 = vmul.f32 %v1788_v55, %v1788_v55  ;;  %v1183_v20 = vpop.permute.xlu1 %1182 }
 0x25e   : > { %v1089_v38 = vpop.permute.xlu0 %1088  ;;  %v1547_v13 = vsel %vm1520_vm9, %v1514_v12, %v1183_v20 }
 0x25f   : > { %v2024_v26 = vadd.f32 %v2023_v54, %v1993_v6  ;;  %v1955_v22 = vadd.f32 %v2369_v41, %v1954_v48  ;;  %v1515_v59 = vsel %vm1487_vm8, %v1482_v36, %v1089_v38 }
 0x261   : > { %v899_v8 = vpop.permute.xlu1 %898  ;;  %v2025_v2 = vadd.f32 %v2024_v26, %v1994_v11 }
 0x262   : > { %v805_v16 = vpop.permute.xlu0 %804  ;;  %v1450_v7 = vsel %vm1421_vm6, %v1417_v45, %v899_v8 }
 0x263   : > { %v1418_v1 = vsel %vm1388_vm5, %v3638_v35, %v805_v16 }
 0x265   : > { %v1279_v23 = vpop.permute.xlu1 %1278 }
 0x266   : > { %v1580_v60 = vsel %vm1553_vm10, %v1547_v13, %v1279_v23  ;;  %v1185_v63 = vpop.permute.xlu0 %1184 }
 0x267   : > { %2397 = vmatprep.mubr.msk.f32.mxu1 %vm1591_vm11, %v1580_v60  ;;  %v1548_v50 = vsel %vm1520_vm9, %v1515_v59, %v1185_v63 }
 0x269   : > { %v995_v61 = vpop.permute.xlu1 %994 }
 0x26a   : > { %v901_v52 = vpop.permute.xlu0 %900  ;;  %v1483_v25 = vsel %vm1454_vm7, %v1450_v7, %v995_v61 }
 0x26b   : > { %v1451_v4 = vsel %vm1421_vm6, %v1418_v1, %v901_v52 }
 0x26d   : > { %v997_v10 = vpop.permute.xlu1 %996 }
 0x26e   : > { %v1281_v29 = vpop.permute.xlu0 %1280  ;;  %v1484_v39 = vsel %vm1454_vm7, %v1451_v4, %v997_v10 }
 0x26f   : > { %v1581_v14 = vsel %vm1553_vm10, %v1548_v50, %v1281_v29  ;;  %v2372_v43 = vpop.f32.mrb[8].mxu0 }
 0x270   : > { %1926 = vst [vmem:[%s4165_s11 + $0x48] sm:$0xff] %v2372_v43  ;;  %v1798_v53 = vpop.f32.mrb[9].mxu0  ;;  %2398 = vmatmul.mubr.msk.f32.gmra.mrb[10].mxu1 %vm1591_vm11, %v1581_v14  ;;  %v1996_v9 = vmul.f32 %v2372_v43, %v2372_v43 }
 0x271   : > { %1925 = vst [vmem:[%s4165_s11 + $0x40] sm:$0xff] %v1798_v53  ;;  %v1956_v47 = vadd.f32 %v1955_v22, %v1798_v53  ;;  %v1995_v18 = vmul.f32 %v1798_v53, %v1798_v53  ;;  %v807_v42 = vpop.permute.xlu1 %806 }
 0x272   : > { %v1091_v24 = vpop.permute.xlu0 %1090  ;;  %v1419_v58 = vsel %vm1388_vm5, %v3657_v30, %v807_v42 }
 0x273   : > { %v2026_v37 = vadd.f32 %v2025_v2, %v1995_v18  ;;  %v1957_v28 = vadd.f32 %v2372_v43, %v1956_v47  ;;  %v1516_v44 = vsel %vm1487_vm8, %v1483_v25, %v1091_v24 }
 0x275   : > { %v1187_v19 = vpop.permute.xlu1 %1186  ;;  %v2027_v21 = vadd.f32 %v2026_v37, %v1996_v9 }
 0x276   : > { %v1093_v49 = vpop.permute.xlu0 %1092  ;;  %v1549_v33 = vsel %vm1520_vm9, %v1516_v44, %v1187_v19 }
 0x277   : > { %v1517_v0 = vsel %vm1487_vm8, %v1484_v39, %v1093_v49 }
 0x279   : > { %v903_v5 = vpop.permute.xlu1 %902 }
 0x27a   : > { %v809_v54 = vpop.permute.xlu0 %808  ;;  %v1452_v12 = vsel %vm1421_vm6, %v1419_v58, %v903_v5 }
 0x27b   : > { %v1420_v8 = vsel %vm1388_vm5, %v3654_v15, %v809_v54 }
 0x27d   : > { %v1283_v40 = vpop.permute.xlu1 %1282 }
 0x27e   : > { %v1582_v57 = vsel %vm1553_vm10, %v1549_v33, %v1283_v40  ;;  %v1189_v32 = vpop.permute.xlu0 %1188 }
 0x27f   : > { %2400 = vmatprep.mubr.msk.f32.mxu1 %vm1591_vm11, %v1582_v57  ;;  %v1550_v48 = vsel %vm1520_vm9, %v1517_v0, %v1189_v32 }
 0x281   : > { %v999_v62 = vpop.permute.xlu1 %998 }
 0x282   : > { %v905_v27 = vpop.permute.xlu0 %904  ;;  %v1485_v23 = vsel %vm1454_vm7, %v1452_v12, %v999_v62 }
 0x283   : > { %v2375_v46 = vpop.f32.mrb[10].mxu0  ;;  %v1453_v16 = vsel %vm1421_vm6, %v1420_v8, %v905_v27 }
 0x284   : > { %1928 = vst [vmem:[%s4165_s11 + $0x58] sm:$0xff] %v2375_v46  ;;  %v1808_v31 = vpop.f32.mrb[11].mxu0  ;;  %v1998_v20 = vmul.f32 %v2375_v46, %v2375_v46 }
 0x285   : > { %1927 = vst [vmem:[%s4165_s11 + $0x50] sm:$0xff] %v1808_v31  ;;  %v1958_v3 = vadd.f32 %v1957_v28, %v1808_v31  ;;  %v1997_v41 = vmul.f32 %v1808_v31, %v1808_v31  ;;  %v1001_v55 = vpop.permute.xlu1 %1000 }
 0x286   : > { %v1285_v6 = vpop.permute.xlu0 %1284  ;;  %v1486_v13 = vsel %vm1454_vm7, %v1453_v16, %v1001_v55 }
 0x287   : > { %v2028_v38 = vadd.f32 %v2027_v21, %v1997_v41  ;;  %v1583_v35 = vsel %vm1553_vm10, %v1550_v48, %v1285_v6  ;;  %v1959_v11 = vadd.f32 %v2375_v46, %v1958_v3 }
 0x288   : > { %2401 = vmatmul.mubr.msk.f32.gmra.mrb[12].mxu1 %vm1591_vm11, %v1583_v35 }
 0x289   : > { %v1097_v26 = vpop.permute.xlu1 %1096  ;;  %v2029_v22 = vadd.f32 %v2028_v38, %v1998_v20 }
 0x28a   : > { %v1095_v51 = vpop.permute.xlu0 %1094  ;;  %v1519_v60 = vsel %vm1487_vm8, %v1486_v13, %v1097_v26 }
 0x28b   : > { %v1518_v63 = vsel %vm1487_vm8, %v1485_v23, %v1095_v51 }
 0x28d   : > { %v1193_v2 = vpop.permute.xlu1 %1192 }
 0x28e   : > { %v1191_v17 = vpop.permute.xlu0 %1190  ;;  %v1552_v15 = vsel %vm1520_vm9, %v1519_v60, %v1193_v2 }
 0x28f   : > { %v1551_v30 = vsel %vm1520_vm9, %v1518_v63, %v1191_v17 }
 0x291   : > { %v1289_v61 = vpop.permute.xlu1 %1288 }
 0x292   : > { %v1585_v34 = vsel %vm1553_vm10, %v1552_v15, %v1289_v61  ;;  %v1287_v52 = vpop.permute.xlu0 %1286 }
 0x293   : > { %v1584_v56 = vsel %vm1553_vm10, %v1551_v30, %v1287_v52 }
 0x294   : > { %2403 = vmatprep.mubr.msk.f32.mxu1 %vm1591_vm11, %v1584_v56 }
 0x295   : > { %2404 = vmatmul.mubr.msk.f32.gmra.mrb[14].mxu1 %vm1591_vm11, %v1585_v34 }
 0x29b   : > { %v2378_v36 = vpop.f32.mrb[12].mxu0 }
 0x29c   : > { %1930 = vst [vmem:[%s4165_s11 + $0x68] sm:$0xff] %v2378_v36  ;;  %v1818_v59 = vpop.f32.mrb[13].mxu0  ;;  %v2000_v29 = vmul.f32 %v2378_v36, %v2378_v36 }
 0x29d   : > { %1929 = vst [vmem:[%s4165_s11 + $0x60] sm:$0xff] %v1818_v59  ;;  %v1960_v10 = vadd.f32 %v1959_v11, %v1818_v59  ;;  %v1999_v50 = vmul.f32 %v1818_v59, %v1818_v59 }
 0x29f   : > { %v2030_v14 = vadd.f32 %v2029_v22, %v1999_v50  ;;  %v1961_v43 = vadd.f32 %v2378_v36, %v1960_v10 }
 0x2a1   : > { %v2031_v53 = vadd.f32 %v2030_v14, %v2000_v29 }
 0x2b3   : > { %v2381_v47 = vpop.f32.mrb[14].mxu0 }
 0x2b4   : > { %1932 = vst [vmem:[%s4165_s11 + $0x78] sm:$0xff] %v2381_v47  ;;  %v1828_v18 = vpop.f32.mrb[15].mxu0  ;;  %v2002_v9 = vmul.f32 %v2381_v47, %v2381_v47 }
 0x2b5   : > { %1931 = vst [vmem:[%s4165_s11 + $0x70] sm:$0xff] %v1828_v18  ;;  %v1962_v42 = vadd.f32 %v1961_v43, %v1828_v18  ;;  %v2001_v24 = vmul.f32 %v1828_v18, %v1828_v18 }
 0x2b7   : > { %v1963_v37 = vadd.f32 %v2381_v47, %v1962_v42  ;;  %v2032_v28 = vadd.f32 %v2031_v53, %v2001_v24 }
 0x2b9   : > { %v2033_v19 = vadd.f32 %v2032_v28, %v2002_v9 }
 0x2cb   : > { %v2384_v21 = vpop.f32.mrb[0].mxu1 }
 0x2cc   : > { %1934 = vst [vmem:[%s4165_s11 + $0x88] sm:$0xff] %v2384_v21  ;;  %v1838_v49 = vpop.f32.mrb[1].mxu1  ;;  %v2004_v7 = vmul.f32 %v2384_v21, %v2384_v21 }
 0x2cd   : > { %1933 = vst [vmem:[%s4165_s11 + $0x80] sm:$0xff] %v1838_v49  ;;  %v1964_v45 = vadd.f32 %v1963_v37, %v1838_v49  ;;  %v2003_v5 = vmul.f32 %v1838_v49, %v1838_v49 }
 0x2cf   : > { %v2034_v54 = vadd.f32 %v2033_v19, %v2003_v5  ;;  %v1965_v25 = vadd.f32 %v2384_v21, %v1964_v45 }
 0x2d1   : > { %v2035_v44 = vadd.f32 %v2034_v54, %v2004_v7 }
 0x2e3   : > { %v2387_v33 = vpop.f32.mrb[2].mxu1 }
 0x2e4   : > { %1936 = vst [vmem:[%s4165_s11 + $0x98] sm:$0xff] %v2387_v33  ;;  %v1848_v40 = vpop.f32.mrb[3].mxu1  ;;  %v2006_v62 = vmul.f32 %v2387_v33, %v2387_v33 }
 0x2e5   : > { %1935 = vst [vmem:[%s4165_s11 + $0x90] sm:$0xff] %v1848_v40  ;;  %v1966_v57 = vadd.f32 %v1965_v25, %v1848_v40  ;;  %v2005_v32 = vmul.f32 %v1848_v40, %v1848_v40 }
 0x2e7   : > { %v2036_v1 = vadd.f32 %v2035_v44, %v2005_v32  ;;  %v1967_v27 = vadd.f32 %v2387_v33, %v1966_v57 }
 0x2e9   : > { %v2037_v4 = vadd.f32 %v2036_v1, %v2006_v62 }
 0x2fb   : > { %v2390_v46 = vpop.f32.mrb[4].mxu1 }
 0x2fc   : > { %1938 = vst [vmem:[%s4165_s11 + $0xa8] sm:$0xff] %v2390_v46  ;;  %v1858_v39 = vpop.f32.mrb[5].mxu1  ;;  %v2008_v3 = vmul.f32 %v2390_v46, %v2390_v46 }
 0x2fd   : > { %1937 = vst [vmem:[%s4165_s11 + $0xa0] sm:$0xff] %v1858_v39  ;;  %v1968_v31 = vadd.f32 %v1967_v27, %v1858_v39  ;;  %v2007_v0 = vmul.f32 %v1858_v39, %v1858_v39 }
 0x2ff   : > { %v2038_v41 = vadd.f32 %v2037_v4, %v2007_v0  ;;  %v1969_v55 = vadd.f32 %v2390_v46, %v1968_v31 }
 0x301   : > { %v2039_v48 = vadd.f32 %v2038_v41, %v2008_v3 }
 0x313   : > { %v2393_v6 = vpop.f32.mrb[6].mxu1 }
 0x314   : > { %1940 = vst [vmem:[%s4165_s11 + $0xb8] sm:$0xff] %v2393_v6  ;;  %v1868_v20 = vpop.f32.mrb[7].mxu1  ;;  %v2010_v11 = vmul.f32 %v2393_v6, %v2393_v6 }
 0x315   : > { %1939 = vst [vmem:[%s4165_s11 + $0xb0] sm:$0xff] %v1868_v20  ;;  %v1970_v38 = vadd.f32 %v1969_v55, %v1868_v20  ;;  %v2009_v35 = vmul.f32 %v1868_v20, %v1868_v20 }
 0x317   : > { %v2040_v26 = vadd.f32 %v2039_v48, %v2009_v35  ;;  %v1971_v22 = vadd.f32 %v2393_v6, %v1970_v38 }
 0x319   : > { %v2041_v51 = vadd.f32 %v2040_v26, %v2010_v11 }
 0x32b   : > { %v2396_v8 = vpop.f32.mrb[8].mxu1 }
 0x32c   : > { %1942 = vst [vmem:[%s4165_s11 + $0xc8] sm:$0xff] %v2396_v8  ;;  %v1878_v2 = vpop.f32.mrb[9].mxu1  ;;  %v2012_v17 = vmul.f32 %v2396_v8, %v2396_v8 }
 0x32d   : > { %1941 = vst [vmem:[%s4165_s11 + $0xc0] sm:$0xff] %v1878_v2  ;;  %v1972_v58 = vadd.f32 %v1971_v22, %v1878_v2  ;;  %v2011_v16 = vmul.f32 %v1878_v2, %v1878_v2 }
 0x32f   : > { %v2042_v12 = vadd.f32 %v2041_v51, %v2011_v16  ;;  %v1973_v13 = vadd.f32 %v2396_v8, %v1972_v58 }
 0x331   : > { %v2043_v23 = vadd.f32 %v2042_v12, %v2012_v17 }
 0x343   : > { %v2399_v60 = vpop.f32.mrb[10].mxu1 }
 0x344   : > { %1944 = vst [vmem:[%s4165_s11 + $0xd8] sm:$0xff] %v2399_v60  ;;  %v1888_v63 = vpop.f32.mrb[11].mxu1  ;;  %v2014_v30 = vmul.f32 %v2399_v60, %v2399_v60 }
 0x345   : > { %1943 = vst [vmem:[%s4165_s11 + $0xd0] sm:$0xff] %v1888_v63  ;;  %v1974_v15 = vadd.f32 %v1973_v13, %v1888_v63  ;;  %v2013_v61 = vmul.f32 %v1888_v63, %v1888_v63 }
 0x347   : > { %v2044_v34 = vadd.f32 %v2043_v23, %v2013_v61  ;;  %v1975_v52 = vadd.f32 %v2399_v60, %v1974_v15 }
 0x349   : > { %v2045_v56 = vadd.f32 %v2044_v34, %v2014_v30 }
 0x35b   : > { %v2402_v36 = vpop.f32.mrb[12].mxu1 }
 0x35c   : > { %1946 = vst [vmem:[%s4165_s11 + $0xe8] sm:$0xff] %v2402_v36  ;;  %v1898_v59 = vpop.f32.mrb[13].mxu1  ;;  %v2016_v29 = vmul.f32 %v2402_v36, %v2402_v36 }
 0x35d   : > { %1945 = vst [vmem:[%s4165_s11 + $0xe0] sm:$0xff] %v1898_v59  ;;  %v1976_v10 = vadd.f32 %v1975_v52, %v1898_v59  ;;  %v2015_v50 = vmul.f32 %v1898_v59, %v1898_v59 }
 0x35f   : > { %v2046_v14 = vadd.f32 %v2045_v56, %v2015_v50  ;;  %v1977_v43 = vadd.f32 %v2402_v36, %v1976_v10 }
 0x361   : > { %v2047_v53 = vadd.f32 %v2046_v14, %v2016_v29 }
 0x368   : > { %v2405_v47 = vpop.f32.mrb[14].mxu1 }
 0x369   : > { %1948 = vst [vmem:[%s4165_s11 + $0xf8] sm:$0xff] %v2405_v47  ;;  %v1908_v18 = vpop.f32.mrb[15].mxu1 }
 0x36a   : > { %1947 = vst [vmem:[%s4165_s11 + $0xf0] sm:$0xff] %v1908_v18  ;;  %v1978_v42 = vadd.f32 %v1977_v43, %v1908_v18  ;;  %v2017_v24 = vmul.f32 %v1908_v18, %v1908_v18 }
 0x36b   : > { %2526 = shalt.err (!%p2523_p5)
}
 0x36c   : > { %s2527_s7 = scalar_lea.hbm %s4294_s6, 4096  ;;  %s2531_s30 = scalar_lea.hbm %s4423_s2, 8192 }
 0x36d   : > { %p2528_p6 = scmp.ne.s32.totalorder %s4294_s6, %s2527_s7  ;;  %p2532_p10 = scmp.lt.u32.totalorder %s4294_s6, %s4423_s2 }
 0x36e   : > { %p2533_p11 = scmp.lt.u32.totalorder %s2531_s30, %s2527_s7  ;;  %p2535_p13 = scmp.lt.u32.totalorder %s2527_s7, %s4294_s6 }
 0x36f   : > { %p2529_p7 = pnand %p2528_p6, %p2732_p4 }
 0x370   : > { %p2534_p12 = por %p2533_p11, %p2532_p10 }
 0x371   : > { %p2530_p9 = pneg %p2529_p7 }
 0x372   : > { %p2536_p0 = por %p2535_p13, %p2534_p12 }
 0x374   : > { %p2537_p1 = pnand %p2536_p0, %p2530_p9 }
 0x376   : > { %2540 = shalt.err (!%p2537_p1)
}
 0x377   : > { %s2662_s12 = smov 128   ;;  %v2018_v9 = vmul.f32 %v2405_v47, %v2405_v47  ;;  %v1979_v37 = vadd.f32 %v2405_v47, %v1978_v42  ;;  %v2048_v28 = vadd.f32 %v2047_v53, %v2017_v24  ;;  %s4327_s14 = sand.u32 1, %s2260_s21  }
 0x378   : > { %2421 = dma.vmem_to_hbm [thread:$0]  (%p2732_p4), %s4296_s29, 4096, %s4294_s6, %s2058_s8, %s2662_s12, %s2662_s12, %s2654_s9  }
 0x379   : > { %v1980_v19 = vrot.slane %v1979_v37, 4  ;;  %v2049_v21 = vadd.f32 %v2048_v28, %v2018_v9  ;;  %s2305_s24 = sshll.u32 %s2643_s18, 4  ;;  %s244_s7 = scalar_lea.vmem [#allocation4], %s4145_s10 }
 0x37a   : > { %s2100_s9 = sshll.u32 %s244_s7, 4  ;;  %s250_s29 = scalar_lea.vmem [#allocation6], %s4145_s10  ;;  %s4339_s9 = int_to_ptr.vmem [resolvable:$true] %s2100_s9 }
 0x37b   : > { %v1981_v49 = vadd.f32 %v1980_v19, %v1979_v37  ;;  %v2050_v45 = vrot.slane %v2049_v21, 4  ;;  %s2115_s6 = sshll.u32 %s250_s29, 4  ;;  %s4337_s26 = scalar_lea.hbm %s4424_s3, %s2305_s24  ;;  %s4346_s6 = int_to_ptr.vmem [resolvable:$true] %s2115_s6 }
 0x37c   : > { %s4344_s30 = scalar_lea.hbm %s4425_s4, %s2305_s24  ;;  %s2063_s5 = scalar_lea.sflag [#allocation5], %s4327_s14 }
 0x37d   : > { %v1982_v5 = vrot.slane %v1981_v49, 2  ;;  %v2051_v7 = vadd.f32 %v2050_v45, %v2049_v21  ;;  %s2541_s13 = scalar_lea.vmem %s4339_s9, 16  ;;  %s2663_s12 = smov [#allocation4]  }
 0x37e   : > { %p2542_p2 = scmp.ne.s32.totalorder %s4339_s9, %s2541_s13  ;;  %s2545_s8 = sshll.u32 %s2663_s12, 4  ;;  %s2546_s8 = int_to_ptr.vmem [resolvable:$false] %s2545_s8 }
 0x37f   : > { %v2052_v54 = vrot.slane %v2051_v7, 2  ;;  %v1983_v25 = vadd.f32 %v1982_v5, %v1981_v49  ;;  %s2547_s11 = scalar_lea.vmem %s2546_s8, 32  ;;  %p2548_p6 = scmp.lt.s32.totalorder %s4339_s9, %s2546_s8 }
 0x380   : > { %p2543_p3 = pnand %p2542_p2, %p2732_p4  ;;  %p2549_p7 = scmp.lt.s32.totalorder %s2547_s11, %s2541_s13 }
 0x381   : > { %v1984_v44 = vrot.slane %v1983_v25, 1  ;;  %v2053_v33 = vadd.f32 %v2052_v54, %v2051_v7 }
 0x382   : > { %p2544_p5 = pneg %p2543_p3  ;;  %p2550_p9 = por %p2549_p7, %p2548_p6 }
 0x383   : > { %v1985_v40 = vadd.f32 %v1984_v44, %v1983_v25  ;;  %v2054_v57 = vrot.slane %v2053_v33, 1 }
 0x384   : > { %p2551_p10 = pnand %p2550_p9, %p2544_p5 }
 0x385   : > { %1986 = vst [vmem:[%s244_s7] sm:$0x1] %v1985_v40  ;;  %v2055_v32 = vadd.f32 %v2054_v57, %v2053_v33 }
 0x386   : > { %2554 = shalt.err (!%p2551_p10)
}
 0x387   : > { %s2555_s24 = scalar_lea.hbm %s4337_s26, 16  ;;  %s2559_s21 = scalar_lea.hbm %s4424_s3, 32 }
 0x388   : > { %p2556_p11 = scmp.ne.s32.totalorder %s4337_s26, %s2555_s24  ;;  %p2560_p0 = scmp.lt.u32.totalorder %s4337_s26, %s4424_s3 }
 0x389   : > { %p2561_p1 = scmp.lt.u32.totalorder %s2559_s21, %s2555_s24  ;;  %p2563_p3 = scmp.lt.u32.totalorder %s2555_s24, %s4337_s26 }
 0x38a   : > { %p2557_p12 = pnand %p2556_p11, %p2732_p4 }
 0x38b   : > { %p2562_p2 = por %p2561_p1, %p2560_p0 }
 0x38c   : > { %p2558_p13 = pneg %p2557_p12 }
 0x38d   : > { %p2564_p5 = por %p2563_p3, %p2562_p2 }
 0x38f   : > { %p2565_p6 = pnand %p2564_p5, %p2558_p13 }
 0x391   : > { %2568 = shalt.err (!%p2565_p6)
}
 0x392   : > { %2422 = dma.vmem_to_hbm [thread:$0]  (%p2732_p4), %s4339_s9, 16, %s4337_s26, %s2063_s5   ;;  %2056 = vst [vmem:[%s250_s29] sm:$0x1] %v2055_v32 }
 0x393   : > { %s2569_s13 = scalar_lea.vmem %s4346_s6, 16  ;;  %s2664_s11 = smov [#allocation6]  }
 0x394   : > { %p2570_p7 = scmp.ne.s32.totalorder %s4346_s6, %s2569_s13  ;;  %s2573_s24 = sshll.u32 %s2664_s11, 4  ;;  %s2574_s24 = int_to_ptr.vmem [resolvable:$false] %s2573_s24 }
 0x395   : > { %s2575_s7 = scalar_lea.vmem %s2574_s24, 32  ;;  %p2576_p11 = scmp.lt.s32.totalorder %s4346_s6, %s2574_s24 }
 0x396   : > { %p2571_p9 = pnand %p2570_p7, %p2732_p4  ;;  %p2577_p12 = scmp.lt.s32.totalorder %s2575_s7, %s2569_s13 }
 0x398   : > { %p2572_p10 = pneg %p2571_p9  ;;  %p2578_p13 = por %p2577_p12, %p2576_p11 }
 0x39a   : > { %p2579_p0 = pnand %p2578_p13, %p2572_p10 }
 0x39c   : > { %2582 = shalt.err (!%p2579_p0)
}
 0x39d   : > { %s2583_s10 = scalar_lea.hbm %s4344_s30, 16  ;;  %s2587_s26 = scalar_lea.hbm %s4425_s4, 32 }
 0x39e   : > { %p2584_p1 = scmp.ne.s32.totalorder %s4344_s30, %s2583_s10  ;;  %p2588_p5 = scmp.lt.u32.totalorder %s4344_s30, %s4425_s4 }
 0x39f   : > { %p2589_p6 = scmp.lt.u32.totalorder %s2587_s26, %s2583_s10  ;;  %p2591_p9 = scmp.lt.u32.totalorder %s2583_s10, %s4344_s30 }
 0x3a0   : > { %p2585_p2 = pnand %p2584_p1, %p2732_p4 }
 0x3a1   : > { %p2590_p7 = por %p2589_p6, %p2588_p5 }
 0x3a2   : > { %p2586_p3 = pneg %p2585_p2 }
 0x3a3   : > { %p2592_p10 = por %p2591_p9, %p2590_p7 }
 0x3a5   : > { %p2593_p11 = pnand %p2592_p10, %p2586_p3 }
 0x3a7   : > { %2596 = shalt.err (!%p2593_p11)
}
 0x3a8   : > { %2423 = dma.vmem_to_hbm [thread:$0]  (%p2732_p4), %s4346_s6, 16, %s4344_s30, %s2063_s5  }
 0x3a9 PF: > { %p2437_p12 = scmp.ge.s32.totalorder %s2651_s20, 2  ;;  %s2127_s12 = sand.u32 1, %s2631_s15  }
 0x3aa   : > { %s2128_s8 = scalar_lea.sflag [#allocation3], %s2127_s12 }
 0x3ab   : > { %p2428_p13 = pnand %p2437_p12, %p2741_p8 }
 0x3ad   : > { %2622 = dma.done.wait (!%p2428_p13), %s2128_s8, 4096  }
 0x3ae   : > { %2624 = vsyncadd (!%p2428_p13), %s2128_s8, 4294963200  ;;  %s2136_s13 = sand.u32 1, %s2261_s22  }
 0x3af   : > { %s2137_s25 = scalar_lea.sflag [#allocation5], %s2136_s13 }
 0x3b0   : > { %2626 = dma.done.wait (!%p2428_p13), %s2137_s25, 32  }
 0x3b1   : > { %2628 = vsyncadd (!%p2428_p13), %s2137_s25, 4294967264  ;;  %s21_s20 = sadd.s32 1, %s2651_s20   ;;  %s4639_s15 = smov %s2635_s16 }
 0x3b2   : > { %p18_p4 = scmp.ge.s32.totalorder %s21_s20, 4   ;;  %s4640_s16 = smov %s2639_s17 }
 0x3b3   : > { %s4641_s17 = smov %s2747_s28  ;;  %s4642_s18 = smov %s2647_s19 }
 0x3b4   : > { %s4643_s19 = smov %s4645_s23  ;;  %20 = sbr.rel (!%p18_p4) target bundleno = 6 (0x6), region = 98 }
 0x3bb   :  { %2149 = vsyncpa [#allocation3], 1 }
 0x3bc   :  { %2151 = vsyncpa [#allocation3 + $0x1], 1 }
 0x3bd   :  { %2152 = vsyncpa [#allocation5], 1 }
 0x3be   :  { %2154 = vsyncpa [#allocation5 + $0x1], 1 }

</bundles_post_ra>
